<compile_context>
chip_gen: v7x
topology: tpu7x:2x2x1
jax: 0.10.0
libtpu: 0.0.40
codegen_flags: <defaults>
</compile_context>

<pallas_src>
import math

import jax
import jax.numpy as jnp
from jax import lax
from jax.experimental import pallas as pl
from jax.experimental.pallas import tpu as pltpu


_VMEM_LIMIT_BYTES = 48 * 1024 * 1024  # headroom below v7x's 64 MiB physical VMEM


# ----------------------------- in-kernel helpers -----------------------------


def _layernorm(xv, g, b, eps=1e-6):
    """Annotated-Transformer LayerNorm: unbiased std, eps added to std."""
    d = xv.shape[-1]
    mean = jnp.mean(xv, axis=-1, keepdims=True)
    diff = xv - mean
    var = jnp.sum(diff * diff, axis=-1, keepdims=True) / (d - 1)
    return g * diff / (jnp.sqrt(var) + eps) + b


def _softmax_rows(s):
    """Row softmax in f32.  Denominator: EUP approximate reciprocal refined by
    one Newton step (off the MXU critical path, ~f32-exact)."""
    s = s - jnp.max(s, axis=-1, keepdims=True)
    p = jnp.exp(s)
    d = jnp.sum(p, axis=-1, keepdims=True)
    r = pl.reciprocal(d, approx=True)
    r = r * (2.0 - d * r)                                   # Newton refinement
    return p * r


def _pick_tile(n, cap, min_tile=8):
    """Largest power-of-two divisor of n that is <= cap and >= min_tile,
    else n (full extent, always layout-legal)."""
    t = cap
    while t >= min_tile:
        if n % t == 0:
            return t
        t //= 2
    return n


def _const_spec(shape, grid_arity):
    """BlockSpec for a grid-invariant (weight/bias) operand: constant index map
    and a single VMEM buffer (no pointless double-buffering)."""
    if grid_arity == 2:
        idx = lambda a, b, _s=shape: (0,) * len(_s)
    else:
        idx = lambda a, _s=shape: (0,) * len(_s)
    return pl.BlockSpec(shape, idx, pipeline_mode=pl.Buffered(1))


# ------------------------------ fused sublayers ------------------------------


def fused_self_attn_sublayer(x, ln_g, ln_b, wqkv, bqkv, wo, bo, tgt_mask_i32,
                             n_heads, *, causal, compute_dtype, q_block=None):
    """out = x + OutProj(MHA(LN(x), LN(x), LN(x), tgt_mask)).

    Grid = (batch, query-row tiles), both parallel.  K/V are computed from the
    full sequence per step; Q / residual only for the query tile.
    """
    B, S, D = x.shape
    dk = D // n_heads
    scale = 1.0 / math.sqrt(dk)
    cdt = compute_dtype
    tq = _pick_tile(S, q_block or 256)
    nq = S // tq

    def kernel(*refs):
        if causal:
            (xt_ref, xf_ref, g_ref, b_ref, wqkv_ref, bqkv_ref, wo_ref, bo_ref,
             o_ref, ctx_ref) = refs
        else:
            (xt_ref, xf_ref, g_ref, b_ref, wqkv_ref, bqkv_ref, wo_ref, bo_ref,
             m_ref, o_ref, ctx_ref) = refs
        qi = pl.program_id(1)

        xt = xt_ref[0]                                       # (tq, D) residual rows
        nxt = _layernorm(xt, g_ref[...], b_ref[...]).astype(cdt)
        nxf = _layernorm(xf_ref[0], g_ref[...], b_ref[...]).astype(cdt)

        # Q for this query tile, fused K/V over the full sequence.  Bias add in
        # f32, then ONE wide cast to the MXU compute dtype.
        q = (jnp.dot(nxt, wqkv_ref[:, :D],
                     preferred_element_type=jnp.float32)
             + bqkv_ref[:, :D]).astype(cdt)                  # (tq, D)
        kv = (jnp.dot(nxf, wqkv_ref[:, D:],
                      preferred_element_type=jnp.float32)
              + bqkv_ref[:, D:]).astype(cdt)                 # (S, 2D)

        if causal:
            row = qi * tq + lax.broadcasted_iota(jnp.int32, (tq, S), 0)
            col = lax.broadcasted_iota(jnp.int32, (tq, S), 1)
            allow = col <= row                               # in-kernel causal mask
        else:
            allow = m_ref[0] != 0                            # (tq, S) int mask

        # Per-head attention; each head's context lands in a static (tq, dk)
        # column block of the (tq, D) VMEM buffer so the output projection is
        # a single full-K matmul after the loop.
        for h in range(n_heads):                             # static unroll
            qh = q[:, h * dk:(h + 1) * dk]
            kh = kv[:, h * dk:(h + 1) * dk]
            vh = kv[:, D + h * dk:D + (h + 1) * dk]
            s = lax.dot_general(qh, kh, (((1,), (1,)), ((), ())),
                                preferred_element_type=jnp.float32) * scale
            s = jnp.where(allow, s, -1e9)
            p = _softmax_rows(s)                             # f32 softmax
            ctx_ref[:, h * dk:(h + 1) * dk] = jnp.dot(
                p.astype(cdt), vh,
                preferred_element_type=jnp.float32).astype(cdt)

        out = xt + bo_ref[...] + jnp.dot(ctx_ref[...], wo_ref[...],
                                         preferred_element_type=jnp.float32)
        o_ref[0] = out                                       # dense (tq, D) store

    in_specs = [
        pl.BlockSpec((1, tq, D), lambda b, q_: (b, q_, 0)),  # x query tile / residual
        pl.BlockSpec((1, S, D), lambda b, q_: (b, 0, 0)),    # x full sequence (K/V)
        _const_spec((1, D), 2), _const_spec((1, D), 2),      # LN gamma / beta
        _const_spec((D, 3 * D), 2),                          # fused QKV weight (cdt)
        _const_spec((1, 3 * D), 2),                          # fused QKV bias (f32)
        _const_spec((D, D), 2),                              # out-proj weight (cdt)
        _const_spec((1, D), 2),                              # out-proj bias
    ]
    args = [x, x, ln_g.reshape(1, D), ln_b.reshape(1, D),
            wqkv.astype(cdt), bqkv.reshape(1, 3 * D),
            wo.astype(cdt), bo.reshape(1, D)]
    if not causal:
        in_specs.append(pl.BlockSpec((1, tq, S), lambda b, q_: (b, q_, 0)))
        args.append(tgt_mask_i32)

    cost = pl.CostEstimate(
        flops=2 * B * (S * D * D + 2 * nq * S * D * D + 2 * S * S * D + S * D * D),
        transcendentals=B * n_heads * S * S,
        bytes_accessed=4 * B * S * D * (2 + nq)
        + jnp.dtype(cdt).itemsize * 4 * D * D + 4 * 8 * D)

    # NOTE: x is passed twice (tile + full sequence), so the residual buffer is
    # NOT aliased onto the output here (write-back of early q-tiles would race
    # the full-sequence reads of later q-tiles).
    return pl.pallas_call(
        kernel,
        out_shape=jax.ShapeDtypeStruct((B, S, D), jnp.float32),
        grid=(B, nq),
        in_specs=in_specs,
        out_specs=pl.BlockSpec((1, tq, D), lambda b, q_: (b, q_, 0)),
        scratch_shapes=[pltpu.VMEM((tq, D), cdt)],
        compiler_params=pltpu.CompilerParams(
            dimension_semantics=("parallel", "parallel"),
            vmem_limit_bytes=_VMEM_LIMIT_BYTES),
        cost_estimate=cost,
    )(*args)


def fused_cross_attn_sublayer(x, memory, ln_g, ln_b, wq, bq, wkv, bkv, wo, bo,
                              src_mask_i32, n_heads, *, compute_dtype,
                              q_block=None):
    """out = x + OutProj(MHA(LN(x), memory, memory, src_mask)); one pallas_call
    with a (batch, query-tile) parallel grid."""
    B, Sq, D = x.shape
    Sk = memory.shape[1]
    dk = D // n_heads
    scale = 1.0 / math.sqrt(dk)
    cdt = compute_dtype
    tq = _pick_tile(Sq, q_block or 256)
    nq = Sq // tq

    def kernel(x_ref, mem_ref, g_ref, b_ref, wq_ref, bq_ref, wkv_ref, bkv_ref,
               wo_ref, bo_ref, m_ref, o_ref, ctx_ref):
        xt = x_ref[0]                                        # (tq, D) residual
        nxt = _layernorm(xt, g_ref[...], b_ref[...]).astype(cdt)
        memb = mem_ref[0].astype(cdt)                        # (Sk, D)

        q = (jnp.dot(nxt, wq_ref[...],
                     preferred_element_type=jnp.float32) + bq_ref[...]).astype(cdt)
        kv = (jnp.dot(memb, wkv_ref[...],                    # fused K/V projection
                      preferred_element_type=jnp.float32) + bkv_ref[...]).astype(cdt)
        allow = m_ref[0] != 0                                # (1, Sk), bcast over q

        for h in range(n_heads):
            qh = q[:, h * dk:(h + 1) * dk]
            kh = kv[:, h * dk:(h + 1) * dk]
            vh = kv[:, D + h * dk:D + (h + 1) * dk]
            s = lax.dot_general(qh, kh, (((1,), (1,)), ((), ())),
                                preferred_element_type=jnp.float32) * scale
            s = jnp.where(allow, s, -1e9)
            p = _softmax_rows(s)
            ctx_ref[:, h * dk:(h + 1) * dk] = jnp.dot(
                p.astype(cdt), vh,
                preferred_element_type=jnp.float32).astype(cdt)

        out = xt + bo_ref[...] + jnp.dot(ctx_ref[...], wo_ref[...],
                                         preferred_element_type=jnp.float32)
        o_ref[0] = out

    cost = pl.CostEstimate(
        flops=2 * B * (Sq * D * D + 2 * nq * Sk * D * D + 2 * Sq * Sk * D + Sq * D * D),
        transcendentals=B * n_heads * Sq * Sk,
        bytes_accessed=4 * B * (2 * Sq * D + nq * Sk * D + Sk)
        + jnp.dtype(cdt).itemsize * 4 * D * D)

    return pl.pallas_call(
        kernel,
        out_shape=jax.ShapeDtypeStruct((B, Sq, D), jnp.float32),
        grid=(B, nq),
        in_specs=[
            pl.BlockSpec((1, tq, D), lambda b, q_: (b, q_, 0)),   # x (residual/Q)
            pl.BlockSpec((1, Sk, D), lambda b, q_: (b, 0, 0)),    # memory (K/V)
            _const_spec((1, D), 2), _const_spec((1, D), 2),       # LN gamma / beta
            _const_spec((D, D), 2),                               # wq (cdt)
            _const_spec((1, D), 2),                               # bq
            _const_spec((D, 2 * D), 2),                           # fused KV weight
            _const_spec((1, 2 * D), 2),                           # fused KV bias
            _const_spec((D, D), 2),                               # wo (cdt)
            _const_spec((1, D), 2),                               # bo
            pl.BlockSpec((1, 1, Sk), lambda b, q_: (b, 0, 0)),    # compact src mask
        ],
        out_specs=pl.BlockSpec((1, tq, D), lambda b, q_: (b, q_, 0)),
        scratch_shapes=[pltpu.VMEM((tq, D), cdt)],
        input_output_aliases={0: 0},                         # reuse residual buffer
        compiler_params=pltpu.CompilerParams(
            dimension_semantics=("parallel", "parallel"),
            vmem_limit_bytes=_VMEM_LIMIT_BYTES),
        cost_estimate=cost,
    )(x, memory, ln_g.reshape(1, D), ln_b.reshape(1, D),
      wq.astype(cdt), bq.reshape(1, D), wkv.astype(cdt), bkv.reshape(1, 2 * D),
      wo.astype(cdt), bo.reshape(1, D), src_mask_i32)


def fused_ffn_sublayer(x, ln_g, ln_b, w1, b1, w2, b2, *, compute_dtype,
                       row_block=None, ff_block=None):
    """out = x + W2 @ ReLU(W1 @ LN(x) + b1) + b2.

    Grid = (row tiles [parallel], Dff tiles [arbitrary]); the output block is
    resident across the Dff axis and used directly as the f32 accumulator.
    """
    B, S, D = x.shape
    Dff = w1.shape[1]
    N = B * S
    cdt = compute_dtype
    tm = _pick_tile(N, row_block or 512)                 # big row tiles (>= roofline)
    tk = _pick_tile(Dff, ff_block or 512, min_tile=128)  # Dff (K) tiling
    nk = Dff // tk

    def kernel(x_ref, g_ref, b_ref, w1_ref, b1_ref, w2_ref, b2_ref, o_ref,
               nx_ref):
        k = pl.program_id(1)

        @pl.when(k == 0)
        def _():
            xv = x_ref[...]                                  # (tm, D) f32 residual
            nx_ref[...] = _layernorm(xv, g_ref[...], b_ref[...]).astype(cdt)
            o_ref[...] = xv + b2_ref[...]                    # residual + final bias

        h = (jnp.dot(nx_ref[...], w1_ref[...],
                     preferred_element_type=jnp.float32) + b1_ref[...])
        h = jnp.maximum(h, 0.0).astype(cdt)
        o_ref[...] += jnp.dot(h, w2_ref[...],
                              preferred_element_type=jnp.float32)

    cost = pl.CostEstimate(
        flops=4 * N * D * Dff,
        transcendentals=0,
        bytes_accessed=4 * 2 * N * D + jnp.dtype(cdt).itemsize * 2 * D * Dff)

    out = pl.pallas_call(
        kernel,
        out_shape=jax.ShapeDtypeStruct((N, D), jnp.float32),
        grid=(N // tm, nk),
        in_specs=[
            pl.BlockSpec((tm, D), lambda i, k: (i, 0)),      # x rows (residual + LN)
            _const_spec((1, D), 2), _const_spec((1, D), 2),  # LN gamma / beta
            pl.BlockSpec((D, tk), lambda i, k: (0, k)),      # W1 Dff-tile
            pl.BlockSpec((1, tk), lambda i, k: (0, k)),      # b1 Dff-tile
            pl.BlockSpec((tk, D), lambda i, k: (k, 0)),      # W2 Dff-tile
            _const_spec((1, D), 2),                          # b2
        ],
        out_specs=pl.BlockSpec((tm, D), lambda i, k: (i, 0)),
        scratch_shapes=[pltpu.VMEM((tm, D), cdt)],           # LN(x) cache across k
        input_output_aliases={0: 0},
        compiler_params=pltpu.CompilerParams(
            dimension_semantics=("parallel", "arbitrary"),
            vmem_limit_bytes=_VMEM_LIMIT_BYTES),
        cost_estimate=cost,
    )(x.reshape(N, D), ln_g.reshape(1, D), ln_b.reshape(1, D),
      w1.astype(cdt), b1.reshape(1, Dff), w2.astype(cdt), b2.reshape(1, D))
    return out.reshape(B, S, D)


# ------------------------------ model wrapper --------------------------------


def decoder_layer(params, x, memory, src_mask, tgt_mask, n_heads,
                  compute_dtype=jnp.bfloat16, tgt_is_causal=True,
                  q_block=None, ff_block=None):
    """Transformer decoder layer forward (dropout = identity in eval mode).

    compute_dtype controls MXU operand dtype only; LayerNorm / softmax /
    accumulators are always f32.  bf16 is the MXU-native fast path on
    v5e / v6e / v7x.
    """
    B, S, D = x.shape
    Sk = memory.shape[1]
    sa, ca = params["self_attn"], params["src_attn"]

    # Fold Q/K/V (self-attn) and K/V (cross-attn) into single wide matmuls.
    wqkv = jnp.concatenate([sa["wq"], sa["wk"], sa["wv"]], axis=1)
    bqkv = jnp.concatenate([sa["bq"], sa["bk"], sa["bv"]])
    wkv = jnp.concatenate([ca["wk"], ca["wv"]], axis=1)
    bkv = jnp.concatenate([ca["bk"], ca["bv"]])

    # Compact integer masks per batch; the causal tgt mask is generated inside
    # the kernel when tgt_is_causal=True.  NOTE: fully-masked rows give a
    # uniform ~1/Sk attention (matches the reference's -1e9 masking).
    if tgt_is_causal:
        tgt_mask_i32 = None
    else:
        tgt_mask_i32 = jnp.broadcast_to(
            tgt_mask != 0, (B, 1, S, S))[:, 0].astype(jnp.int32)
    src_mask_i32 = jnp.broadcast_to(
        src_mask != 0, (B, 1, 1, Sk))[:, 0].astype(jnp.int32)

    x = fused_self_attn_sublayer(
        x, params["ln0_g"], params["ln0_b"], wqkv, bqkv, sa["wo"], sa["bo"],
        tgt_mask_i32, n_heads, causal=tgt_is_causal, compute_dtype=compute_dtype,
        q_block=q_block)
    x = fused_cross_attn_sublayer(
        x, memory, params["ln1_g"], params["ln1_b"], ca["wq"], ca["bq"],
        wkv, bkv, ca["wo"], ca["bo"], src_mask_i32, n_heads,
        compute_dtype=compute_dtype, q_block=q_block)
    x = fused_ffn_sublayer(
        x, params["ln2_g"], params["ln2_b"],
        params["ffn_w1"], params["ffn_b1"], params["ffn_w2"], params["ffn_b2"],
        compute_dtype=compute_dtype, ff_block=ff_block)
    return x


# ----------------------------- pure-JAX reference ----------------------------


def _ref_layernorm(x, g, b, eps=1e-6):
    mean = x.mean(-1, keepdims=True)
    var = ((x - mean) ** 2).sum(-1, keepdims=True) / (x.shape[-1] - 1)
    return g * (x - mean) / (jnp.sqrt(var) + eps) + b


def _ref_mha(p, query, key, value, mask, n_heads):
    B, Sq, D = query.shape
    Sk = key.shape[1]
    dk = D // n_heads
    q = (query @ p["wq"] + p["bq"]).reshape(B, Sq, n_heads, dk).transpose(0, 2, 1, 3)
    k = (key @ p["wk"] + p["bk"]).reshape(B, Sk, n_heads, dk).transpose(0, 2, 1, 3)
    v = (value @ p["wv"] + p["bv"]).reshape(B, Sk, n_heads, dk).transpose(0, 2, 1, 3)
    s = jnp.einsum("bhqd,bhkd->bhqk", q, k) / math.sqrt(dk)
    s = jnp.where(mask == 0, -1e9, s)
    a = jax.nn.softmax(s, axis=-1)
    o = jnp.einsum("bhqk,bhkd->bhqd", a, v).transpose(0, 2, 1, 3).reshape(B, Sq, D)
    return o @ p["wo"] + p["bo"]


def _ref_decoder_layer(params, x, memory, src_mask, tgt_mask, n_heads):
    nx = _ref_layernorm(x, params["ln0_g"], params["ln0_b"])
    x = x + _ref_mha(params["self_attn"], nx, nx, nx, tgt_mask, n_heads)
    nx = _ref_layernorm(x, params["ln1_g"], params["ln1_b"])
    x = x + _ref_mha(params["src_attn"], nx, memory, memory, src_mask, n_heads)
    nx = _ref_layernorm(x, params["ln2_g"], params["ln2_b"])
    h = jnp.maximum(nx @ params["ffn_w1"] + params["ffn_b1"], 0.0)
    return x + h @ params["ffn_w2"] + params["ffn_b2"]


# ---------------------------------- setup ------------------------------------


def _init_linear(key, din, dout):
    k1, k2 = jax.random.split(key)
    bound = 1.0 / math.sqrt(din)
    w = jax.random.uniform(k1, (din, dout), jnp.float32, -bound, bound)
    b = jax.random.uniform(k2, (dout,), jnp.float32, -bound, bound)
    return w, b


def _init_attn(key, d_model):
    ks = jax.random.split(key, 4)
    wq, bq = _init_linear(ks[0], d_model, d_model)
    wk, bk = _init_linear(ks[1], d_model, d_model)
    wv, bv = _init_linear(ks[2], d_model, d_model)
    wo, bo = _init_linear(ks[3], d_model, d_model)
    return dict(wq=wq, bq=bq, wk=wk, bk=bk, wv=wv, bv=bv, wo=wo, bo=bo)


def init_params(key, d_model, d_ff):
    ks = jax.random.split(key, 4)
    w1, b1 = _init_linear(ks[2], d_model, d_ff)
    w2, b2 = _init_linear(ks[3], d_ff, d_model)
    return dict(
        ln0_g=jnp.ones((d_model,), jnp.float32), ln0_b=jnp.zeros((d_model,), jnp.float32),
        ln1_g=jnp.ones((d_model,), jnp.float32), ln1_b=jnp.zeros((d_model,), jnp.float32),
        ln2_g=jnp.ones((d_model,), jnp.float32), ln2_b=jnp.zeros((d_model,), jnp.float32),
        self_attn=_init_attn(ks[0], d_model),
        src_attn=_init_attn(ks[1], d_model),
        ffn_w1=w1, ffn_b1=b1, ffn_w2=w2, ffn_b2=b2,
    )


if __name__ == "__main__":
    # Small shapes; q_block=8 / ff_block=128 deliberately exercise the
    # multi-tile query grid and the Dff-tiled FFN accumulator paths.
    B, S_TGT, S_SRC, D_MODEL, D_FF, N_HEADS = 2, 16, 16, 32, 256, 4

    root = jax.random.PRNGKey(0)
    kp, kx, km = jax.random.split(root, 3)

    params = init_params(kp, D_MODEL, D_FF)
    x = jax.random.normal(kx, (B, S_TGT, D_MODEL), jnp.float32)
    memory = jax.random.normal(km, (B, S_SRC, D_MODEL), jnp.float32)

    # tgt_mask: causal (1,1,S_tgt,S_tgt); src_mask: all-visible (B,1,1,S_src).
    tgt_mask = jnp.tril(jnp.ones((S_TGT, S_TGT), jnp.float32))[None, None, :, :]
    src_mask = jnp.ones((B, 1, 1, S_SRC), jnp.float32)

    run = jax.jit(decoder_layer,
                  static_argnames=("n_heads", "compute_dtype", "tgt_is_causal",
                                   "q_block", "ff_block"))

    ref = _ref_decoder_layer(params, x, memory, src_mask, tgt_mask, N_HEADS)

    # bf16 MXU operands (native fast path on v5e / v6e / v7x); f32 LN/softmax/acc.
    out_bf16 = run(params, x, memory, src_mask, tgt_mask, n_heads=N_HEADS,
                   compute_dtype=jnp.bfloat16, tgt_is_causal=True,
                   q_block=8, ff_block=128)
    out_bf16 = jax.block_until_ready(out_bf16)
    assert out_bf16.shape == (B, S_TGT, D_MODEL)
    assert jnp.allclose(out_bf16, ref, atol=1e-1, rtol=1e-1), "bf16 kernel mismatch"

    # f32 MXU-operand path (tight-accuracy / validation).  Tolerance kept
    # conservative; the Newton-refined softmax reciprocal is ~f32-exact.
    out_f32 = run(params, x, memory, src_mask, tgt_mask, n_heads=N_HEADS,
                  compute_dtype=jnp.float32, tgt_is_causal=True,
                  q_block=8, ff_block=128)
    out_f32 = jax.block_until_ready(out_f32)
    assert jnp.allclose(out_f32, ref, atol=2e-2, rtol=2e-2), "f32 kernel mismatch"

    print("KERNEL_OK")
</pallas_src>

<mosaic_0001>
module attributes {stable_mosaic.version = 11 : i64} {
  func.func @kernel(%arg0: i32, %arg1: i32, %arg2: memref<1x8x32xf32, #tpu.memory_space<vmem>>, %arg3: memref<1x16x32xf32, #tpu.memory_space<vmem>>, %arg4: memref<1x32xf32, #tpu.memory_space<vmem>>, %arg5: memref<1x32xf32, #tpu.memory_space<vmem>>, %arg6: memref<32x32xbf16, #tpu.memory_space<vmem>>, %arg7: memref<1x32xf32, #tpu.memory_space<vmem>>, %arg8: memref<32x64xbf16, #tpu.memory_space<vmem>>, %arg9: memref<1x64xf32, #tpu.memory_space<vmem>>, %arg10: memref<32x32xbf16, #tpu.memory_space<vmem>>, %arg11: memref<1x32xf32, #tpu.memory_space<vmem>>, %arg12: memref<1x1x16xi32, #tpu.memory_space<vmem>>, %arg13: memref<1x8x32xf32, #tpu.memory_space<vmem>>, %arg14: memref<8x32xbf16, #tpu.memory_space<vmem>>) attributes {dimension_semantics = [#tpu.dimension_semantics<parallel>, #tpu.dimension_semantics<parallel>], iteration_bounds = array<i64: 2, 2>, scalar_prefetch = 0 : i64, scratch_operands = 1 : i64, tpu.core_type = #tpu.core_type<tc>, window_params = [{transform_indices = @transform_0, window_bounds = array<i64: 1, 8, 32>}, {transform_indices = @transform_1, window_bounds = array<i64: 1, 16, 32>}, {pipeline_mode = #tpu.pipeline_mode<synchronous>, transform_indices = @transform_2, window_bounds = array<i64: 1, 32>}, {pipeline_mode = #tpu.pipeline_mode<synchronous>, transform_indices = @transform_3, window_bounds = array<i64: 1, 32>}, {pipeline_mode = #tpu.pipeline_mode<synchronous>, transform_indices = @transform_4, window_bounds = array<i64: 32, 32>}, {pipeline_mode = #tpu.pipeline_mode<synchronous>, transform_indices = @transform_5, window_bounds = array<i64: 1, 32>}, {pipeline_mode = #tpu.pipeline_mode<synchronous>, transform_indices = @transform_6, window_bounds = array<i64: 32, 64>}, {pipeline_mode = #tpu.pipeline_mode<synchronous>, transform_indices = @transform_7, window_bounds = array<i64: 1, 64>}, {pipeline_mode = #tpu.pipeline_mode<synchronous>, transform_indices = @transform_8, window_bounds = array<i64: 32, 32>}, {pipeline_mode = #tpu.pipeline_mode<synchronous>, transform_indices = @transform_9, window_bounds = array<i64: 1, 32>}, {transform_indices = @transform_10, window_bounds = array<i64: 1, 1, 16>}, {transform_indices = @transform_11, window_bounds = array<i64: 1, 8, 32>}]} {
    %c0 = arith.constant 0 : index
    %c0_0 = arith.constant 0 : index
    %c0_1 = arith.constant 0 : index
    %0 = vector.load %arg2[%c0, %c0_0, %c0_1] : memref<1x8x32xf32, #tpu.memory_space<vmem>>, vector<1x8x32xf32>
    %1 = vector.shape_cast %0 : vector<1x8x32xf32> to vector<8x32xf32>
    %c0_2 = arith.constant 0 : index
    %c0_3 = arith.constant 0 : index
    %2 = vector.load %arg4[%c0_2, %c0_3] : memref<1x32xf32, #tpu.memory_space<vmem>>, vector<1x32xf32>
    %c0_4 = arith.constant 0 : index
    %c0_5 = arith.constant 0 : index
    %3 = vector.load %arg5[%c0_4, %c0_5] : memref<1x32xf32, #tpu.memory_space<vmem>>, vector<1x32xf32>
    %cst = arith.constant dense<0.000000e+00> : vector<8xf32>
    %4 = vector.multi_reduction <add>, %1, %cst [1] : vector<8x32xf32> to vector<8xf32>
    %5 = vector.shape_cast %4 : vector<8xf32> to vector<8x1xf32>
    %cst_6 = arith.constant 3.200000e+01 : f32
    %6 = vector.broadcast %cst_6 : f32 to vector<8x1xf32>
    %7 = arith.divf %5, %6 : vector<8x1xf32>
    %8 = vector.broadcast %7 : vector<8x1xf32> to vector<8x32xf32>
    %9 = arith.subf %1, %8 : vector<8x32xf32>
    %10 = arith.mulf %9, %9 : vector<8x32xf32>
    %cst_7 = arith.constant dense<0.000000e+00> : vector<8xf32>
    %11 = vector.multi_reduction <add>, %10, %cst_7 [1] : vector<8x32xf32> to vector<8xf32>
    %12 = vector.shape_cast %11 : vector<8xf32> to vector<8x1xf32>
    %cst_8 = arith.constant 3.100000e+01 : f32
    %13 = vector.broadcast %cst_8 : f32 to vector<8x1xf32>
    %14 = arith.divf %12, %13 : vector<8x1xf32>
    %15 = vector.broadcast %2 : vector<1x32xf32> to vector<8x32xf32>
    %16 = arith.mulf %15, %9 : vector<8x32xf32>
    %17 = math.sqrt %14 : vector<8x1xf32>
    %cst_9 = arith.constant 9.99999997E-7 : f32
    %18 = vector.broadcast %cst_9 : f32 to vector<8x1xf32>
    %19 = arith.addf %17, %18 : vector<8x1xf32>
    %20 = vector.broadcast %19 : vector<8x1xf32> to vector<8x32xf32>
    %21 = arith.divf %16, %20 : vector<8x32xf32>
    %22 = vector.broadcast %3 : vector<1x32xf32> to vector<8x32xf32>
    %23 = arith.addf %21, %22 : vector<8x32xf32>
    %24 = arith.truncf %23 : vector<8x32xf32> to vector<8x32xbf16>
    %c0_10 = arith.constant 0 : index
    %c0_11 = arith.constant 0 : index
    %c0_12 = arith.constant 0 : index
    %25 = vector.load %arg3[%c0_10, %c0_11, %c0_12] : memref<1x16x32xf32, #tpu.memory_space<vmem>>, vector<1x16x32xf32>
    %26 = vector.shape_cast %25 : vector<1x16x32xf32> to vector<16x32xf32>
    %27 = arith.truncf %26 : vector<16x32xf32> to vector<16x32xbf16>
    %c0_13 = arith.constant 0 : index
    %c0_14 = arith.constant 0 : index
    %28 = vector.load %arg6[%c0_13, %c0_14] : memref<32x32xbf16, #tpu.memory_space<vmem>>, vector<32x32xbf16>
    %cst_15 = arith.constant dense<0.000000e+00> : vector<8x32xf32>
    %29 = tpu.matmul %24, %28, %cst_15 {dimension_numbers = #tpu.dot_dimension_numbers<[1], [0], [0], [1], [0, 0, 1, 1], [], []>} : vector<8x32xbf16>, vector<32x32xbf16>, vector<8x32xf32> -> vector<8x32xf32>
    %c0_16 = arith.constant 0 : index
    %c0_17 = arith.constant 0 : index
    %30 = vector.load %arg7[%c0_16, %c0_17] : memref<1x32xf32, #tpu.memory_space<vmem>>, vector<1x32xf32>
    %31 = vector.broadcast %30 : vector<1x32xf32> to vector<8x32xf32>
    %32 = arith.addf %29, %31 : vector<8x32xf32>
    %33 = arith.truncf %32 : vector<8x32xf32> to vector<8x32xbf16>
    %c0_18 = arith.constant 0 : index
    %c0_19 = arith.constant 0 : index
    %34 = vector.load %arg8[%c0_18, %c0_19] : memref<32x64xbf16, #tpu.memory_space<vmem>>, vector<32x64xbf16>
    %cst_20 = arith.constant dense<0.000000e+00> : vector<16x64xf32>
    %35 = tpu.matmul %27, %34, %cst_20 {dimension_numbers = #tpu.dot_dimension_numbers<[1], [0], [0], [1], [0, 0, 1, 1], [], []>} : vector<16x32xbf16>, vector<32x64xbf16>, vector<16x64xf32> -> vector<16x64xf32>
    %c0_21 = arith.constant 0 : index
    %c0_22 = arith.constant 0 : index
    %36 = vector.load %arg9[%c0_21, %c0_22] : memref<1x64xf32, #tpu.memory_space<vmem>>, vector<1x64xf32>
    %37 = vector.broadcast %36 : vector<1x64xf32> to vector<16x64xf32>
    %38 = arith.addf %35, %37 : vector<16x64xf32>
    %39 = arith.truncf %38 : vector<16x64xf32> to vector<16x64xbf16>
    %c0_23 = arith.constant 0 : index
    %c0_24 = arith.constant 0 : index
    %c0_25 = arith.constant 0 : index
    %40 = vector.load %arg12[%c0_23, %c0_24, %c0_25] : memref<1x1x16xi32, #tpu.memory_space<vmem>>, vector<1x1x16xi32>
    %41 = vector.shape_cast %40 : vector<1x1x16xi32> to vector<1x16xi32>
    %c0_i32 = arith.constant 0 : i32
    %42 = vector.broadcast %c0_i32 : i32 to vector<1x16xi32>
    %43 = arith.cmpi ne, %41, %42 : vector<1x16xi32>
    %44 = vector.extract_strided_slice %33 {offsets = [0, 0], sizes = [8, 8], strides = [1, 1]} : vector<8x32xbf16> to vector<8x8xbf16>
    %45 = vector.extract_strided_slice %39 {offsets = [0, 0], sizes = [16, 8], strides = [1, 1]} : vector<16x64xbf16> to vector<16x8xbf16>
    %46 = vector.extract_strided_slice %39 {offsets = [0, 32], sizes = [16, 8], strides = [1, 1]} : vector<16x64xbf16> to vector<16x8xbf16>
    %cst_26 = arith.constant dense<0.000000e+00> : vector<8x16xf32>
    %47 = tpu.matmul %44, %45, %cst_26 {dimension_numbers = #tpu.dot_dimension_numbers<[1], [1], [0], [0], [0, 0, 1, 0], [], []>} : vector<8x8xbf16>, vector<16x8xbf16>, vector<8x16xf32> -> vector<8x16xf32>
    %cst_27 = arith.constant 0.353553385 : f32
    %48 = vector.broadcast %cst_27 : f32 to vector<8x16xf32>
    %49 = arith.mulf %47, %48 : vector<8x16xf32>
    %cst_28 = arith.constant -1.000000e+09 : f32
    %50 = vector.shape_cast %43 : vector<1x16xi1> to vector<1x16xi1>
    %51 = vector.broadcast %50 : vector<1x16xi1> to vector<8x16xi1>
    %52 = vector.broadcast %cst_28 : f32 to vector<8x16xf32>
    %53 = arith.select %51, %49, %52 : vector<8x16xi1>, vector<8x16xf32>
    %cst_29 = arith.constant dense<0xFF800000> : vector<8xf32>
    %54 = vector.multi_reduction <maximumf>, %53, %cst_29 [1] : vector<8x16xf32> to vector<8xf32>
    %55 = vector.shape_cast %54 : vector<8xf32> to vector<8x1xf32>
    %56 = vector.broadcast %55 : vector<8x1xf32> to vector<8x16xf32>
    %57 = arith.subf %53, %56 : vector<8x16xf32>
    %58 = math.exp %57 : vector<8x16xf32>
    %cst_30 = arith.constant dense<0.000000e+00> : vector<8xf32>
    %59 = vector.multi_reduction <add>, %58, %cst_30 [1] : vector<8x16xf32> to vector<8xf32>
    %60 = vector.shape_cast %59 : vector<8xf32> to vector<8x1xf32>
    %61 = tpu.reciprocal %60 {approx = true} : vector<8x1xf32> -> vector<8x1xf32>
    %62 = arith.mulf %60, %61 : vector<8x1xf32>
    %cst_31 = arith.constant 2.000000e+00 : f32
    %63 = vector.broadcast %cst_31 : f32 to vector<8x1xf32>
    %64 = arith.subf %63, %62 : vector<8x1xf32>
    %65 = arith.mulf %61, %64 : vector<8x1xf32>
    %66 = vector.broadcast %65 : vector<8x1xf32> to vector<8x16xf32>
    %67 = arith.mulf %58, %66 : vector<8x16xf32>
    %68 = arith.truncf %67 : vector<8x16xf32> to vector<8x16xbf16>
    %cst_32 = arith.constant dense<0.000000e+00> : vector<8x8xf32>
    %69 = tpu.matmul %68, %46, %cst_32 {dimension_numbers = #tpu.dot_dimension_numbers<[1], [0], [0], [1], [0, 0, 1, 1], [], []>} : vector<8x16xbf16>, vector<16x8xbf16>, vector<8x8xf32> -> vector<8x8xf32>
    %70 = arith.truncf %69 : vector<8x8xf32> to vector<8x8xbf16>
    %c0_33 = arith.constant 0 : index
    %c0_34 = arith.constant 0 : index
    %71 = vector.load %arg14[%c0_33, %c0_34] : memref<8x32xbf16, #tpu.memory_space<vmem>>, vector<8x8xbf16>
    tpu.vector_store %arg14[%c0_33, %c0_34], %70 {strides = array<i32>} : memref<8x32xbf16, #tpu.memory_space<vmem>>, vector<8x8xbf16>,
    %72 = vector.extract_strided_slice %33 {offsets = [0, 8], sizes = [8, 8], strides = [1, 1]} : vector<8x32xbf16> to vector<8x8xbf16>
    %73 = vector.extract_strided_slice %39 {offsets = [0, 8], sizes = [16, 8], strides = [1, 1]} : vector<16x64xbf16> to vector<16x8xbf16>
    %74 = vector.extract_strided_slice %39 {offsets = [0, 40], sizes = [16, 8], strides = [1, 1]} : vector<16x64xbf16> to vector<16x8xbf16>
    %cst_35 = arith.constant dense<0.000000e+00> : vector<8x16xf32>
    %75 = tpu.matmul %72, %73, %cst_35 {dimension_numbers = #tpu.dot_dimension_numbers<[1], [1], [0], [0], [0, 0, 1, 0], [], []>} : vector<8x8xbf16>, vector<16x8xbf16>, vector<8x16xf32> -> vector<8x16xf32>
    %cst_36 = arith.constant 0.353553385 : f32
    %76 = vector.broadcast %cst_36 : f32 to vector<8x16xf32>
    %77 = arith.mulf %75, %76 : vector<8x16xf32>
    %cst_37 = arith.constant -1.000000e+09 : f32
    %78 = vector.shape_cast %43 : vector<1x16xi1> to vector<1x16xi1>
    %79 = vector.broadcast %78 : vector<1x16xi1> to vector<8x16xi1>
    %80 = vector.broadcast %cst_37 : f32 to vector<8x16xf32>
    %81 = arith.select %79, %77, %80 : vector<8x16xi1>, vector<8x16xf32>
    %cst_38 = arith.constant dense<0xFF800000> : vector<8xf32>
    %82 = vector.multi_reduction <maximumf>, %81, %cst_38 [1] : vector<8x16xf32> to vector<8xf32>
    %83 = vector.shape_cast %82 : vector<8xf32> to vector<8x1xf32>
    %84 = vector.broadcast %83 : vector<8x1xf32> to vector<8x16xf32>
    %85 = arith.subf %81, %84 : vector<8x16xf32>
    %86 = math.exp %85 : vector<8x16xf32>
    %cst_39 = arith.constant dense<0.000000e+00> : vector<8xf32>
    %87 = vector.multi_reduction <add>, %86, %cst_39 [1] : vector<8x16xf32> to vector<8xf32>
    %88 = vector.shape_cast %87 : vector<8xf32> to vector<8x1xf32>
    %89 = tpu.reciprocal %88 {approx = true} : vector<8x1xf32> -> vector<8x1xf32>
    %90 = arith.mulf %88, %89 : vector<8x1xf32>
    %cst_40 = arith.constant 2.000000e+00 : f32
    %91 = vector.broadcast %cst_40 : f32 to vector<8x1xf32>
    %92 = arith.subf %91, %90 : vector<8x1xf32>
    %93 = arith.mulf %89, %92 : vector<8x1xf32>
    %94 = vector.broadcast %93 : vector<8x1xf32> to vector<8x16xf32>
    %95 = arith.mulf %86, %94 : vector<8x16xf32>
    %96 = arith.truncf %95 : vector<8x16xf32> to vector<8x16xbf16>
    %cst_41 = arith.constant dense<0.000000e+00> : vector<8x8xf32>
    %97 = tpu.matmul %96, %74, %cst_41 {dimension_numbers = #tpu.dot_dimension_numbers<[1], [0], [0], [1], [0, 0, 1, 1], [], []>} : vector<8x16xbf16>, vector<16x8xbf16>, vector<8x8xf32> -> vector<8x8xf32>
    %98 = arith.truncf %97 : vector<8x8xf32> to vector<8x8xbf16>
    %c0_42 = arith.constant 0 : index
    %c8 = arith.constant 8 : index
    %99 = vector.load %arg14[%c0_42, %c8] : memref<8x32xbf16, #tpu.memory_space<vmem>>, vector<8x8xbf16>
    tpu.vector_store %arg14[%c0_42, %c8], %98 {strides = array<i32>} : memref<8x32xbf16, #tpu.memory_space<vmem>>, vector<8x8xbf16>,
    %100 = vector.extract_strided_slice %33 {offsets = [0, 16], sizes = [8, 8], strides = [1, 1]} : vector<8x32xbf16> to vector<8x8xbf16>
    %101 = vector.extract_strided_slice %39 {offsets = [0, 16], sizes = [16, 8], strides = [1, 1]} : vector<16x64xbf16> to vector<16x8xbf16>
    %102 = vector.extract_strided_slice %39 {offsets = [0, 48], sizes = [16, 8], strides = [1, 1]} : vector<16x64xbf16> to vector<16x8xbf16>
    %cst_43 = arith.constant dense<0.000000e+00> : vector<8x16xf32>
    %103 = tpu.matmul %100, %101, %cst_43 {dimension_numbers = #tpu.dot_dimension_numbers<[1], [1], [0], [0], [0, 0, 1, 0], [], []>} : vector<8x8xbf16>, vector<16x8xbf16>, vector<8x16xf32> -> vector<8x16xf32>
    %cst_44 = arith.constant 0.353553385 : f32
    %104 = vector.broadcast %cst_44 : f32 to vector<8x16xf32>
    %105 = arith.mulf %103, %104 : vector<8x16xf32>
    %cst_45 = arith.constant -1.000000e+09 : f32
    %106 = vector.shape_cast %43 : vector<1x16xi1> to vector<1x16xi1>
    %107 = vector.broadcast %106 : vector<1x16xi1> to vector<8x16xi1>
    %108 = vector.broadcast %cst_45 : f32 to vector<8x16xf32>
    %109 = arith.select %107, %105, %108 : vector<8x16xi1>, vector<8x16xf32>
    %cst_46 = arith.constant dense<0xFF800000> : vector<8xf32>
    %110 = vector.multi_reduction <maximumf>, %109, %cst_46 [1] : vector<8x16xf32> to vector<8xf32>
    %111 = vector.shape_cast %110 : vector<8xf32> to vector<8x1xf32>
    %112 = vector.broadcast %111 : vector<8x1xf32> to vector<8x16xf32>
    %113 = arith.subf %109, %112 : vector<8x16xf32>
    %114 = math.exp %113 : vector<8x16xf32>
    %cst_47 = arith.constant dense<0.000000e+00> : vector<8xf32>
    %115 = vector.multi_reduction <add>, %114, %cst_47 [1] : vector<8x16xf32> to vector<8xf32>
    %116 = vector.shape_cast %115 : vector<8xf32> to vector<8x1xf32>
    %117 = tpu.reciprocal %116 {approx = true} : vector<8x1xf32> -> vector<8x1xf32>
    %118 = arith.mulf %116, %117 : vector<8x1xf32>
    %cst_48 = arith.constant 2.000000e+00 : f32
    %119 = vector.broadcast %cst_48 : f32 to vector<8x1xf32>
    %120 = arith.subf %119, %118 : vector<8x1xf32>
    %121 = arith.mulf %117, %120 : vector<8x1xf32>
    %122 = vector.broadcast %121 : vector<8x1xf32> to vector<8x16xf32>
    %123 = arith.mulf %114, %122 : vector<8x16xf32>
    %124 = arith.truncf %123 : vector<8x16xf32> to vector<8x16xbf16>
    %cst_49 = arith.constant dense<0.000000e+00> : vector<8x8xf32>
    %125 = tpu.matmul %124, %102, %cst_49 {dimension_numbers = #tpu.dot_dimension_numbers<[1], [0], [0], [1], [0, 0, 1, 1], [], []>} : vector<8x16xbf16>, vector<16x8xbf16>, vector<8x8xf32> -> vector<8x8xf32>
    %126 = arith.truncf %125 : vector<8x8xf32> to vector<8x8xbf16>
    %c0_50 = arith.constant 0 : index
    %c16 = arith.constant 16 : index
    %127 = vector.load %arg14[%c0_50, %c16] : memref<8x32xbf16, #tpu.memory_space<vmem>>, vector<8x8xbf16>
    tpu.vector_store %arg14[%c0_50, %c16], %126 {strides = array<i32>} : memref<8x32xbf16, #tpu.memory_space<vmem>>, vector<8x8xbf16>,
    %128 = vector.extract_strided_slice %33 {offsets = [0, 24], sizes = [8, 8], strides = [1, 1]} : vector<8x32xbf16> to vector<8x8xbf16>
    %129 = vector.extract_strided_slice %39 {offsets = [0, 24], sizes = [16, 8], strides = [1, 1]} : vector<16x64xbf16> to vector<16x8xbf16>
    %130 = vector.extract_strided_slice %39 {offsets = [0, 56], sizes = [16, 8], strides = [1, 1]} : vector<16x64xbf16> to vector<16x8xbf16>
    %cst_51 = arith.constant dense<0.000000e+00> : vector<8x16xf32>
    %131 = tpu.matmul %128, %129, %cst_51 {dimension_numbers = #tpu.dot_dimension_numbers<[1], [1], [0], [0], [0, 0, 1, 0], [], []>} : vector<8x8xbf16>, vector<16x8xbf16>, vector<8x16xf32> -> vector<8x16xf32>
    %cst_52 = arith.constant 0.353553385 : f32
    %132 = vector.broadcast %cst_52 : f32 to vector<8x16xf32>
    %133 = arith.mulf %131, %132 : vector<8x16xf32>
    %cst_53 = arith.constant -1.000000e+09 : f32
    %134 = vector.shape_cast %43 : vector<1x16xi1> to vector<1x16xi1>
    %135 = vector.broadcast %134 : vector<1x16xi1> to vector<8x16xi1>
    %136 = vector.broadcast %cst_53 : f32 to vector<8x16xf32>
    %137 = arith.select %135, %133, %136 : vector<8x16xi1>, vector<8x16xf32>
    %cst_54 = arith.constant dense<0xFF800000> : vector<8xf32>
    %138 = vector.multi_reduction <maximumf>, %137, %cst_54 [1] : vector<8x16xf32> to vector<8xf32>
    %139 = vector.shape_cast %138 : vector<8xf32> to vector<8x1xf32>
    %140 = vector.broadcast %139 : vector<8x1xf32> to vector<8x16xf32>
    %141 = arith.subf %137, %140 : vector<8x16xf32>
    %142 = math.exp %141 : vector<8x16xf32>
    %cst_55 = arith.constant dense<0.000000e+00> : vector<8xf32>
    %143 = vector.multi_reduction <add>, %142, %cst_55 [1] : vector<8x16xf32> to vector<8xf32>
    %144 = vector.shape_cast %143 : vector<8xf32> to vector<8x1xf32>
    %145 = tpu.reciprocal %144 {approx = true} : vector<8x1xf32> -> vector<8x1xf32>
    %146 = arith.mulf %144, %145 : vector<8x1xf32>
    %cst_56 = arith.constant 2.000000e+00 : f32
    %147 = vector.broadcast %cst_56 : f32 to vector<8x1xf32>
    %148 = arith.subf %147, %146 : vector<8x1xf32>
    %149 = arith.mulf %145, %148 : vector<8x1xf32>
    %150 = vector.broadcast %149 : vector<8x1xf32> to vector<8x16xf32>
    %151 = arith.mulf %142, %150 : vector<8x16xf32>
    %152 = arith.truncf %151 : vector<8x16xf32> to vector<8x16xbf16>
    %cst_57 = arith.constant dense<0.000000e+00> : vector<8x8xf32>
    %153 = tpu.matmul %152, %130, %cst_57 {dimension_numbers = #tpu.dot_dimension_numbers<[1], [0], [0], [1], [0, 0, 1, 1], [], []>} : vector<8x16xbf16>, vector<16x8xbf16>, vector<8x8xf32> -> vector<8x8xf32>
    %154 = arith.truncf %153 : vector<8x8xf32> to vector<8x8xbf16>
    %c0_58 = arith.constant 0 : index
    %c24 = arith.constant 24 : index
    %155 = vector.load %arg14[%c0_58, %c24] : memref<8x32xbf16, #tpu.memory_space<vmem>>, vector<8x8xbf16>
    tpu.vector_store %arg14[%c0_58, %c24], %154 {strides = array<i32>} : memref<8x32xbf16, #tpu.memory_space<vmem>>, vector<8x8xbf16>,
    %c0_59 = arith.constant 0 : index
    %c0_60 = arith.constant 0 : index
    %156 = vector.load %arg11[%c0_59, %c0_60] : memref<1x32xf32, #tpu.memory_space<vmem>>, vector<1x32xf32>
    %157 = vector.broadcast %156 : vector<1x32xf32> to vector<8x32xf32>
    %158 = arith.addf %1, %157 : vector<8x32xf32>
    %c0_61 = arith.constant 0 : index
    %c0_62 = arith.constant 0 : index
    %159 = vector.load %arg14[%c0_61, %c0_62] : memref<8x32xbf16, #tpu.memory_space<vmem>>, vector<8x32xbf16>
    %c0_63 = arith.constant 0 : index
    %c0_64 = arith.constant 0 : index
    %160 = vector.load %arg10[%c0_63, %c0_64] : memref<32x32xbf16, #tpu.memory_space<vmem>>, vector<32x32xbf16>
    %cst_65 = arith.constant dense<0.000000e+00> : vector<8x32xf32>
    %161 = tpu.matmul %159, %160, %cst_65 {dimension_numbers = #tpu.dot_dimension_numbers<[1], [0], [0], [1], [0, 0, 1, 1], [], []>} : vector<8x32xbf16>, vector<32x32xbf16>, vector<8x32xf32> -> vector<8x32xf32>
    %162 = arith.addf %158, %161 : vector<8x32xf32>
    %c0_66 = arith.constant 0 : index
    %c0_67 = arith.constant 0 : index
    %c0_68 = arith.constant 0 : index
    %163 = vector.load %arg13[%c0_66, %c0_67, %c0_68] : memref<1x8x32xf32, #tpu.memory_space<vmem>>, vector<1x8x32xf32>
    %164 = vector.shape_cast %163 : vector<1x8x32xf32> to vector<8x32xf32>
    %165 = vector.shape_cast %162 : vector<8x32xf32> to vector<1x8x32xf32>
    tpu.vector_store %arg13[%c0_66, %c0_67, %c0_68], %165 {strides = array<i32>} : memref<1x8x32xf32, #tpu.memory_space<vmem>>, vector<1x8x32xf32>,
    return
  }
  func.func @transform_0(%arg0: i32, %arg1: i32) -> (i32, i32, i32) {
    %c0_i32 = arith.constant 0 : i32
    %c0_i32_0 = arith.constant 0 : i32
    return %arg0, %arg1, %c0_i32 : i32, i32, i32
  }
  func.func @transform_1(%arg0: i32, %arg1: i32) -> (i32, i32, i32) {
    %c0_i32 = arith.constant 0 : i32
    %c0_i32_0 = arith.constant 0 : i32
    %c0_i32_1 = arith.constant 0 : i32
    return %arg0, %c0_i32, %c0_i32_0 : i32, i32, i32
  }
  func.func @transform_2(%arg0: i32, %arg1: i32) -> (i32, i32) {
    %c0_i32 = arith.constant 0 : i32
    %c0_i32_0 = arith.constant 0 : i32
    %c0_i32_1 = arith.constant 0 : i32
    return %c0_i32, %c0_i32_0 : i32, i32
  }
  func.func @transform_3(%arg0: i32, %arg1: i32) -> (i32, i32) {
    %c0_i32 = arith.constant 0 : i32
    %c0_i32_0 = arith.constant 0 : i32
    %c0_i32_1 = arith.constant 0 : i32
    return %c0_i32, %c0_i32_0 : i32, i32
  }
  func.func @transform_4(%arg0: i32, %arg1: i32) -> (i32, i32) {
    %c0_i32 = arith.constant 0 : i32
    %c0_i32_0 = arith.constant 0 : i32
    %c0_i32_1 = arith.constant 0 : i32
    return %c0_i32, %c0_i32_0 : i32, i32
  }
  func.func @transform_5(%arg0: i32, %arg1: i32) -> (i32, i32) {
    %c0_i32 = arith.constant 0 : i32
    %c0_i32_0 = arith.constant 0 : i32
    %c0_i32_1 = arith.constant 0 : i32
    return %c0_i32, %c0_i32_0 : i32, i32
  }
  func.func @transform_6(%arg0: i32, %arg1: i32) -> (i32, i32) {
    %c0_i32 = arith.constant 0 : i32
    %c0_i32_0 = arith.constant 0 : i32
    %c0_i32_1 = arith.constant 0 : i32
    return %c0_i32, %c0_i32_0 : i32, i32
  }
  func.func @transform_7(%arg0: i32, %arg1: i32) -> (i32, i32) {
    %c0_i32 = arith.constant 0 : i32
    %c0_i32_0 = arith.constant 0 : i32
    %c0_i32_1 = arith.constant 0 : i32
    return %c0_i32, %c0_i32_0 : i32, i32
  }
  func.func @transform_8(%arg0: i32, %arg1: i32) -> (i32, i32) {
    %c0_i32 = arith.constant 0 : i32
    %c0_i32_0 = arith.constant 0 : i32
    %c0_i32_1 = arith.constant 0 : i32
    return %c0_i32, %c0_i32_0 : i32, i32
  }
  func.func @transform_9(%arg0: i32, %arg1: i32) -> (i32, i32) {
    %c0_i32 = arith.constant 0 : i32
    %c0_i32_0 = arith.constant 0 : i32
    %c0_i32_1 = arith.constant 0 : i32
    return %c0_i32, %c0_i32_0 : i32, i32
  }
  func.func @transform_10(%arg0: i32, %arg1: i32) -> (i32, i32, i32) {
    %c0_i32 = arith.constant 0 : i32
    %c0_i32_0 = arith.constant 0 : i32
    %c0_i32_1 = arith.constant 0 : i32
    return %arg0, %c0_i32, %c0_i32_0 : i32, i32, i32
  }
  func.func @transform_11(%arg0: i32, %arg1: i32) -> (i32, i32, i32) {
    %c0_i32 = arith.constant 0 : i32
    %c0_i32_0 = arith.constant 0 : i32
    return %arg0, %arg1, %c0_i32 : i32, i32, i32
  }
}

module attributes {stable_mosaic.version = 11 : i64} {
  func.func @kernel(%arg0: i32, %arg1: i32, %arg2: memref<1x8x32xf32, #tpu.memory_space<vmem>>, %arg3: memref<1x16x32xf32, #tpu.memory_space<vmem>>, %arg4: memref<1x32xf32, #tpu.memory_space<vmem>>, %arg5: memref<1x32xf32, #tpu.memory_space<vmem>>, %arg6: memref<32x96xbf16, #tpu.memory_space<vmem>>, %arg7: memref<1x96xf32, #tpu.memory_space<vmem>>, %arg8: memref<32x32xbf16, #tpu.memory_space<vmem>>, %arg9: memref<1x32xf32, #tpu.memory_space<vmem>>, %arg10: memref<1x8x32xf32, #tpu.memory_space<vmem>>, %arg11: memref<8x32xbf16, #tpu.memory_space<vmem>>) attributes {dimension_semantics = [#tpu.dimension_semantics<parallel>, #tpu.dimension_semantics<parallel>], iteration_bounds = array<i64: 2, 2>, scalar_prefetch = 0 : i64, scratch_operands = 1 : i64, tpu.core_type = #tpu.core_type<tc>, window_params = [{transform_indices = @transform_0, window_bounds = array<i64: 1, 8, 32>}, {transform_indices = @transform_1, window_bounds = array<i64: 1, 16, 32>}, {pipeline_mode = #tpu.pipeline_mode<synchronous>, transform_indices = @transform_2, window_bounds = array<i64: 1, 32>}, {pipeline_mode = #tpu.pipeline_mode<synchronous>, transform_indices = @transform_3, window_bounds = array<i64: 1, 32>}, {pipeline_mode = #tpu.pipeline_mode<synchronous>, transform_indices = @transform_4, window_bounds = array<i64: 32, 96>}, {pipeline_mode = #tpu.pipeline_mode<synchronous>, transform_indices = @transform_5, window_bounds = array<i64: 1, 96>}, {pipeline_mode = #tpu.pipeline_mode<synchronous>, transform_indices = @transform_6, window_bounds = array<i64: 32, 32>}, {pipeline_mode = #tpu.pipeline_mode<synchronous>, transform_indices = @transform_7, window_bounds = array<i64: 1, 32>}, {transform_indices = @transform_8, window_bounds = array<i64: 1, 8, 32>}]} {
    %c0 = arith.constant 0 : index
    %c0_0 = arith.constant 0 : index
    %c0_1 = arith.constant 0 : index
    %0 = vector.load %arg2[%c0, %c0_0, %c0_1] : memref<1x8x32xf32, #tpu.memory_space<vmem>>, vector<1x8x32xf32>
    %1 = vector.shape_cast %0 : vector<1x8x32xf32> to vector<8x32xf32>
    %c0_2 = arith.constant 0 : index
    %c0_3 = arith.constant 0 : index
    %2 = vector.load %arg4[%c0_2, %c0_3] : memref<1x32xf32, #tpu.memory_space<vmem>>, vector<1x32xf32>
    %c0_4 = arith.constant 0 : index
    %c0_5 = arith.constant 0 : index
    %3 = vector.load %arg5[%c0_4, %c0_5] : memref<1x32xf32, #tpu.memory_space<vmem>>, vector<1x32xf32>
    %cst = arith.constant dense<0.000000e+00> : vector<8xf32>
    %4 = vector.multi_reduction <add>, %1, %cst [1] : vector<8x32xf32> to vector<8xf32>
    %5 = vector.shape_cast %4 : vector<8xf32> to vector<8x1xf32>
    %cst_6 = arith.constant 3.200000e+01 : f32
    %6 = vector.broadcast %cst_6 : f32 to vector<8x1xf32>
    %7 = arith.divf %5, %6 : vector<8x1xf32>
    %8 = vector.broadcast %7 : vector<8x1xf32> to vector<8x32xf32>
    %9 = arith.subf %1, %8 : vector<8x32xf32>
    %10 = arith.mulf %9, %9 : vector<8x32xf32>
    %cst_7 = arith.constant dense<0.000000e+00> : vector<8xf32>
    %11 = vector.multi_reduction <add>, %10, %cst_7 [1] : vector<8x32xf32> to vector<8xf32>
    %12 = vector.shape_cast %11 : vector<8xf32> to vector<8x1xf32>
    %cst_8 = arith.constant 3.100000e+01 : f32
    %13 = vector.broadcast %cst_8 : f32 to vector<8x1xf32>
    %14 = arith.divf %12, %13 : vector<8x1xf32>
    %15 = vector.broadcast %2 : vector<1x32xf32> to vector<8x32xf32>
    %16 = arith.mulf %15, %9 : vector<8x32xf32>
    %17 = math.sqrt %14 : vector<8x1xf32>
    %cst_9 = arith.constant 9.99999997E-7 : f32
    %18 = vector.broadcast %cst_9 : f32 to vector<8x1xf32>
    %19 = arith.addf %17, %18 : vector<8x1xf32>
    %20 = vector.broadcast %19 : vector<8x1xf32> to vector<8x32xf32>
    %21 = arith.divf %16, %20 : vector<8x32xf32>
    %22 = vector.broadcast %3 : vector<1x32xf32> to vector<8x32xf32>
    %23 = arith.addf %21, %22 : vector<8x32xf32>
    %24 = arith.truncf %23 : vector<8x32xf32> to vector<8x32xbf16>
    %c0_10 = arith.constant 0 : index
    %c0_11 = arith.constant 0 : index
    %c0_12 = arith.constant 0 : index
    %25 = vector.load %arg3[%c0_10, %c0_11, %c0_12] : memref<1x16x32xf32, #tpu.memory_space<vmem>>, vector<1x16x32xf32>
    %26 = vector.shape_cast %25 : vector<1x16x32xf32> to vector<16x32xf32>
    %c0_13 = arith.constant 0 : index
    %c0_14 = arith.constant 0 : index
    %27 = vector.load %arg4[%c0_13, %c0_14] : memref<1x32xf32, #tpu.memory_space<vmem>>, vector<1x32xf32>
    %c0_15 = arith.constant 0 : index
    %c0_16 = arith.constant 0 : index
    %28 = vector.load %arg5[%c0_15, %c0_16] : memref<1x32xf32, #tpu.memory_space<vmem>>, vector<1x32xf32>
    %cst_17 = arith.constant dense<0.000000e+00> : vector<16xf32>
    %29 = vector.multi_reduction <add>, %26, %cst_17 [1] : vector<16x32xf32> to vector<16xf32>
    %30 = vector.shape_cast %29 : vector<16xf32> to vector<16x1xf32>
    %cst_18 = arith.constant 3.200000e+01 : f32
    %31 = vector.broadcast %cst_18 : f32 to vector<16x1xf32>
    %32 = arith.divf %30, %31 : vector<16x1xf32>
    %33 = vector.broadcast %32 : vector<16x1xf32> to vector<16x32xf32>
    %34 = arith.subf %26, %33 : vector<16x32xf32>
    %35 = arith.mulf %34, %34 : vector<16x32xf32>
    %cst_19 = arith.constant dense<0.000000e+00> : vector<16xf32>
    %36 = vector.multi_reduction <add>, %35, %cst_19 [1] : vector<16x32xf32> to vector<16xf32>
    %37 = vector.shape_cast %36 : vector<16xf32> to vector<16x1xf32>
    %cst_20 = arith.constant 3.100000e+01 : f32
    %38 = vector.broadcast %cst_20 : f32 to vector<16x1xf32>
    %39 = arith.divf %37, %38 : vector<16x1xf32>
    %40 = vector.broadcast %27 : vector<1x32xf32> to vector<16x32xf32>
    %41 = arith.mulf %40, %34 : vector<16x32xf32>
    %42 = math.sqrt %39 : vector<16x1xf32>
    %cst_21 = arith.constant 9.99999997E-7 : f32
    %43 = vector.broadcast %cst_21 : f32 to vector<16x1xf32>
    %44 = arith.addf %42, %43 : vector<16x1xf32>
    %45 = vector.broadcast %44 : vector<16x1xf32> to vector<16x32xf32>
    %46 = arith.divf %41, %45 : vector<16x32xf32>
    %47 = vector.broadcast %28 : vector<1x32xf32> to vector<16x32xf32>
    %48 = arith.addf %46, %47 : vector<16x32xf32>
    %49 = arith.truncf %48 : vector<16x32xf32> to vector<16x32xbf16>
    %c0_22 = arith.constant 0 : index
    %c0_23 = arith.constant 0 : index
    %50 = vector.load %arg6[%c0_22, %c0_23] : memref<32x96xbf16, #tpu.memory_space<vmem>>, vector<32x32xbf16>
    %cst_24 = arith.constant dense<0.000000e+00> : vector<8x32xf32>
    %51 = tpu.matmul %24, %50, %cst_24 {dimension_numbers = #tpu.dot_dimension_numbers<[1], [0], [0], [1], [0, 0, 1, 1], [], []>} : vector<8x32xbf16>, vector<32x32xbf16>, vector<8x32xf32> -> vector<8x32xf32>
    %c0_25 = arith.constant 0 : index
    %c0_26 = arith.constant 0 : index
    %52 = vector.load %arg7[%c0_25, %c0_26] : memref<1x96xf32, #tpu.memory_space<vmem>>, vector<1x32xf32>
    %53 = vector.broadcast %52 : vector<1x32xf32> to vector<8x32xf32>
    %54 = arith.addf %51, %53 : vector<8x32xf32>
    %55 = arith.truncf %54 : vector<8x32xf32> to vector<8x32xbf16>
    %c0_27 = arith.constant 0 : index
    %c32 = arith.constant 32 : index
    %56 = vector.load %arg6[%c0_27, %c32] : memref<32x96xbf16, #tpu.memory_space<vmem>>, vector<32x64xbf16>
    %cst_28 = arith.constant dense<0.000000e+00> : vector<16x64xf32>
    %57 = tpu.matmul %49, %56, %cst_28 {dimension_numbers = #tpu.dot_dimension_numbers<[1], [0], [0], [1], [0, 0, 1, 1], [], []>} : vector<16x32xbf16>, vector<32x64xbf16>, vector<16x64xf32> -> vector<16x64xf32>
    %c0_29 = arith.constant 0 : index
    %c32_30 = arith.constant 32 : index
    %58 = vector.load %arg7[%c0_29, %c32_30] : memref<1x96xf32, #tpu.memory_space<vmem>>, vector<1x64xf32>
    %59 = vector.broadcast %58 : vector<1x64xf32> to vector<16x64xf32>
    %60 = arith.addf %57, %59 : vector<16x64xf32>
    %61 = arith.truncf %60 : vector<16x64xf32> to vector<16x64xbf16>
    %c8_i32 = arith.constant 8 : i32
    %62 = arith.muli %arg1, %c8_i32 : i32
    %63 = tpu.iota {dimensions = array<i32: 0>} : vector<8x16xi32>
    %64 = vector.broadcast %62 : i32 to vector<8x16xi32>
    %65 = arith.addi %64, %63 : vector<8x16xi32>
    %66 = tpu.iota {dimensions = array<i32: 1>} : vector<8x16xi32>
    %67 = arith.cmpi sle, %66, %65 : vector<8x16xi32>
    %68 = vector.extract_strided_slice %55 {offsets = [0, 0], sizes = [8, 8], strides = [1, 1]} : vector<8x32xbf16> to vector<8x8xbf16>
    %69 = vector.extract_strided_slice %61 {offsets = [0, 0], sizes = [16, 8], strides = [1, 1]} : vector<16x64xbf16> to vector<16x8xbf16>
    %70 = vector.extract_strided_slice %61 {offsets = [0, 32], sizes = [16, 8], strides = [1, 1]} : vector<16x64xbf16> to vector<16x8xbf16>
    %cst_31 = arith.constant dense<0.000000e+00> : vector<8x16xf32>
    %71 = tpu.matmul %68, %69, %cst_31 {dimension_numbers = #tpu.dot_dimension_numbers<[1], [1], [0], [0], [0, 0, 1, 0], [], []>} : vector<8x8xbf16>, vector<16x8xbf16>, vector<8x16xf32> -> vector<8x16xf32>
    %cst_32 = arith.constant 0.353553385 : f32
    %72 = vector.broadcast %cst_32 : f32 to vector<8x16xf32>
    %73 = arith.mulf %71, %72 : vector<8x16xf32>
    %cst_33 = arith.constant -1.000000e+09 : f32
    %74 = vector.broadcast %cst_33 : f32 to vector<8x16xf32>
    %75 = arith.select %67, %73, %74 : vector<8x16xi1>, vector<8x16xf32>
    %cst_34 = arith.constant dense<0xFF800000> : vector<8xf32>
    %76 = vector.multi_reduction <maximumf>, %75, %cst_34 [1] : vector<8x16xf32> to vector<8xf32>
    %77 = vector.shape_cast %76 : vector<8xf32> to vector<8x1xf32>
    %78 = vector.broadcast %77 : vector<8x1xf32> to vector<8x16xf32>
    %79 = arith.subf %75, %78 : vector<8x16xf32>
    %80 = math.exp %79 : vector<8x16xf32>
    %cst_35 = arith.constant dense<0.000000e+00> : vector<8xf32>
    %81 = vector.multi_reduction <add>, %80, %cst_35 [1] : vector<8x16xf32> to vector<8xf32>
    %82 = vector.shape_cast %81 : vector<8xf32> to vector<8x1xf32>
    %83 = tpu.reciprocal %82 {approx = true} : vector<8x1xf32> -> vector<8x1xf32>
    %84 = arith.mulf %82, %83 : vector<8x1xf32>
    %cst_36 = arith.constant 2.000000e+00 : f32
    %85 = vector.broadcast %cst_36 : f32 to vector<8x1xf32>
    %86 = arith.subf %85, %84 : vector<8x1xf32>
    %87 = arith.mulf %83, %86 : vector<8x1xf32>
    %88 = vector.broadcast %87 : vector<8x1xf32> to vector<8x16xf32>
    %89 = arith.mulf %80, %88 : vector<8x16xf32>
    %90 = arith.truncf %89 : vector<8x16xf32> to vector<8x16xbf16>
    %cst_37 = arith.constant dense<0.000000e+00> : vector<8x8xf32>
    %91 = tpu.matmul %90, %70, %cst_37 {dimension_numbers = #tpu.dot_dimension_numbers<[1], [0], [0], [1], [0, 0, 1, 1], [], []>} : vector<8x16xbf16>, vector<16x8xbf16>, vector<8x8xf32> -> vector<8x8xf32>
    %92 = arith.truncf %91 : vector<8x8xf32> to vector<8x8xbf16>
    %c0_38 = arith.constant 0 : index
    %c0_39 = arith.constant 0 : index
    %93 = vector.load %arg11[%c0_38, %c0_39] : memref<8x32xbf16, #tpu.memory_space<vmem>>, vector<8x8xbf16>
    tpu.vector_store %arg11[%c0_38, %c0_39], %92 {strides = array<i32>} : memref<8x32xbf16, #tpu.memory_space<vmem>>, vector<8x8xbf16>,
    %94 = vector.extract_strided_slice %55 {offsets = [0, 8], sizes = [8, 8], strides = [1, 1]} : vector<8x32xbf16> to vector<8x8xbf16>
    %95 = vector.extract_strided_slice %61 {offsets = [0, 8], sizes = [16, 8], strides = [1, 1]} : vector<16x64xbf16> to vector<16x8xbf16>
    %96 = vector.extract_strided_slice %61 {offsets = [0, 40], sizes = [16, 8], strides = [1, 1]} : vector<16x64xbf16> to vector<16x8xbf16>
    %cst_40 = arith.constant dense<0.000000e+00> : vector<8x16xf32>
    %97 = tpu.matmul %94, %95, %cst_40 {dimension_numbers = #tpu.dot_dimension_numbers<[1], [1], [0], [0], [0, 0, 1, 0], [], []>} : vector<8x8xbf16>, vector<16x8xbf16>, vector<8x16xf32> -> vector<8x16xf32>
    %cst_41 = arith.constant 0.353553385 : f32
    %98 = vector.broadcast %cst_41 : f32 to vector<8x16xf32>
    %99 = arith.mulf %97, %98 : vector<8x16xf32>
    %cst_42 = arith.constant -1.000000e+09 : f32
    %100 = vector.broadcast %cst_42 : f32 to vector<8x16xf32>
    %101 = arith.select %67, %99, %100 : vector<8x16xi1>, vector<8x16xf32>
    %cst_43 = arith.constant dense<0xFF800000> : vector<8xf32>
    %102 = vector.multi_reduction <maximumf>, %101, %cst_43 [1] : vector<8x16xf32> to vector<8xf32>
    %103 = vector.shape_cast %102 : vector<8xf32> to vector<8x1xf32>
    %104 = vector.broadcast %103 : vector<8x1xf32> to vector<8x16xf32>
    %105 = arith.subf %101, %104 : vector<8x16xf32>
    %106 = math.exp %105 : vector<8x16xf32>
    %cst_44 = arith.constant dense<0.000000e+00> : vector<8xf32>
    %107 = vector.multi_reduction <add>, %106, %cst_44 [1] : vector<8x16xf32> to vector<8xf32>
    %108 = vector.shape_cast %107 : vector<8xf32> to vector<8x1xf32>
    %109 = tpu.reciprocal %108 {approx = true} : vector<8x1xf32> -> vector<8x1xf32>
    %110 = arith.mulf %108, %109 : vector<8x1xf32>
    %cst_45 = arith.constant 2.000000e+00 : f32
    %111 = vector.broadcast %cst_45 : f32 to vector<8x1xf32>
    %112 = arith.subf %111, %110 : vector<8x1xf32>
    %113 = arith.mulf %109, %112 : vector<8x1xf32>
    %114 = vector.broadcast %113 : vector<8x1xf32> to vector<8x16xf32>
    %115 = arith.mulf %106, %114 : vector<8x16xf32>
    %116 = arith.truncf %115 : vector<8x16xf32> to vector<8x16xbf16>
    %cst_46 = arith.constant dense<0.000000e+00> : vector<8x8xf32>
    %117 = tpu.matmul %116, %96, %cst_46 {dimension_numbers = #tpu.dot_dimension_numbers<[1], [0], [0], [1], [0, 0, 1, 1], [], []>} : vector<8x16xbf16>, vector<16x8xbf16>, vector<8x8xf32> -> vector<8x8xf32>
    %118 = arith.truncf %117 : vector<8x8xf32> to vector<8x8xbf16>
    %c0_47 = arith.constant 0 : index
    %c8 = arith.constant 8 : index
    %119 = vector.load %arg11[%c0_47, %c8] : memref<8x32xbf16, #tpu.memory_space<vmem>>, vector<8x8xbf16>
    tpu.vector_store %arg11[%c0_47, %c8], %118 {strides = array<i32>} : memref<8x32xbf16, #tpu.memory_space<vmem>>, vector<8x8xbf16>,
    %120 = vector.extract_strided_slice %55 {offsets = [0, 16], sizes = [8, 8], strides = [1, 1]} : vector<8x32xbf16> to vector<8x8xbf16>
    %121 = vector.extract_strided_slice %61 {offsets = [0, 16], sizes = [16, 8], strides = [1, 1]} : vector<16x64xbf16> to vector<16x8xbf16>
    %122 = vector.extract_strided_slice %61 {offsets = [0, 48], sizes = [16, 8], strides = [1, 1]} : vector<16x64xbf16> to vector<16x8xbf16>
    %cst_48 = arith.constant dense<0.000000e+00> : vector<8x16xf32>
    %123 = tpu.matmul %120, %121, %cst_48 {dimension_numbers = #tpu.dot_dimension_numbers<[1], [1], [0], [0], [0, 0, 1, 0], [], []>} : vector<8x8xbf16>, vector<16x8xbf16>, vector<8x16xf32> -> vector<8x16xf32>
    %cst_49 = arith.constant 0.353553385 : f32
    %124 = vector.broadcast %cst_49 : f32 to vector<8x16xf32>
    %125 = arith.mulf %123, %124 : vector<8x16xf32>
    %cst_50 = arith.constant -1.000000e+09 : f32
    %126 = vector.broadcast %cst_50 : f32 to vector<8x16xf32>
    %127 = arith.select %67, %125, %126 : vector<8x16xi1>, vector<8x16xf32>
    %cst_51 = arith.constant dense<0xFF800000> : vector<8xf32>
    %128 = vector.multi_reduction <maximumf>, %127, %cst_51 [1] : vector<8x16xf32> to vector<8xf32>
    %129 = vector.shape_cast %128 : vector<8xf32> to vector<8x1xf32>
    %130 = vector.broadcast %129 : vector<8x1xf32> to vector<8x16xf32>
    %131 = arith.subf %127, %130 : vector<8x16xf32>
    %132 = math.exp %131 : vector<8x16xf32>
    %cst_52 = arith.constant dense<0.000000e+00> : vector<8xf32>
    %133 = vector.multi_reduction <add>, %132, %cst_52 [1] : vector<8x16xf32> to vector<8xf32>
    %134 = vector.shape_cast %133 : vector<8xf32> to vector<8x1xf32>
    %135 = tpu.reciprocal %134 {approx = true} : vector<8x1xf32> -> vector<8x1xf32>
    %136 = arith.mulf %134, %135 : vector<8x1xf32>
    %cst_53 = arith.constant 2.000000e+00 : f32
    %137 = vector.broadcast %cst_53 : f32 to vector<8x1xf32>
    %138 = arith.subf %137, %136 : vector<8x1xf32>
    %139 = arith.mulf %135, %138 : vector<8x1xf32>
    %140 = vector.broadcast %139 : vector<8x1xf32> to vector<8x16xf32>
    %141 = arith.mulf %132, %140 : vector<8x16xf32>
    %142 = arith.truncf %141 : vector<8x16xf32> to vector<8x16xbf16>
    %cst_54 = arith.constant dense<0.000000e+00> : vector<8x8xf32>
    %143 = tpu.matmul %142, %122, %cst_54 {dimension_numbers = #tpu.dot_dimension_numbers<[1], [0], [0], [1], [0, 0, 1, 1], [], []>} : vector<8x16xbf16>, vector<16x8xbf16>, vector<8x8xf32> -> vector<8x8xf32>
    %144 = arith.truncf %143 : vector<8x8xf32> to vector<8x8xbf16>
    %c0_55 = arith.constant 0 : index
    %c16 = arith.constant 16 : index
    %145 = vector.load %arg11[%c0_55, %c16] : memref<8x32xbf16, #tpu.memory_space<vmem>>, vector<8x8xbf16>
    tpu.vector_store %arg11[%c0_55, %c16], %144 {strides = array<i32>} : memref<8x32xbf16, #tpu.memory_space<vmem>>, vector<8x8xbf16>,
    %146 = vector.extract_strided_slice %55 {offsets = [0, 24], sizes = [8, 8], strides = [1, 1]} : vector<8x32xbf16> to vector<8x8xbf16>
    %147 = vector.extract_strided_slice %61 {offsets = [0, 24], sizes = [16, 8], strides = [1, 1]} : vector<16x64xbf16> to vector<16x8xbf16>
    %148 = vector.extract_strided_slice %61 {offsets = [0, 56], sizes = [16, 8], strides = [1, 1]} : vector<16x64xbf16> to vector<16x8xbf16>
    %cst_56 = arith.constant dense<0.000000e+00> : vector<8x16xf32>
    %149 = tpu.matmul %146, %147, %cst_56 {dimension_numbers = #tpu.dot_dimension_numbers<[1], [1], [0], [0], [0, 0, 1, 0], [], []>} : vector<8x8xbf16>, vector<16x8xbf16>, vector<8x16xf32> -> vector<8x16xf32>
    %cst_57 = arith.constant 0.353553385 : f32
    %150 = vector.broadcast %cst_57 : f32 to vector<8x16xf32>
    %151 = arith.mulf %149, %150 : vector<8x16xf32>
    %cst_58 = arith.constant -1.000000e+09 : f32
    %152 = vector.broadcast %cst_58 : f32 to vector<8x16xf32>
    %153 = arith.select %67, %151, %152 : vector<8x16xi1>, vector<8x16xf32>
    %cst_59 = arith.constant dense<0xFF800000> : vector<8xf32>
    %154 = vector.multi_reduction <maximumf>, %153, %cst_59 [1] : vector<8x16xf32> to vector<8xf32>
    %155 = vector.shape_cast %154 : vector<8xf32> to vector<8x1xf32>
    %156 = vector.broadcast %155 : vector<8x1xf32> to vector<8x16xf32>
    %157 = arith.subf %153, %156 : vector<8x16xf32>
    %158 = math.exp %157 : vector<8x16xf32>
    %cst_60 = arith.constant dense<0.000000e+00> : vector<8xf32>
    %159 = vector.multi_reduction <add>, %158, %cst_60 [1] : vector<8x16xf32> to vector<8xf32>
    %160 = vector.shape_cast %159 : vector<8xf32> to vector<8x1xf32>
    %161 = tpu.reciprocal %160 {approx = true} : vector<8x1xf32> -> vector<8x1xf32>
    %162 = arith.mulf %160, %161 : vector<8x1xf32>
    %cst_61 = arith.constant 2.000000e+00 : f32
    %163 = vector.broadcast %cst_61 : f32 to vector<8x1xf32>
    %164 = arith.subf %163, %162 : vector<8x1xf32>
    %165 = arith.mulf %161, %164 : vector<8x1xf32>
    %166 = vector.broadcast %165 : vector<8x1xf32> to vector<8x16xf32>
    %167 = arith.mulf %158, %166 : vector<8x16xf32>
    %168 = arith.truncf %167 : vector<8x16xf32> to vector<8x16xbf16>
    %cst_62 = arith.constant dense<0.000000e+00> : vector<8x8xf32>
    %169 = tpu.matmul %168, %148, %cst_62 {dimension_numbers = #tpu.dot_dimension_numbers<[1], [0], [0], [1], [0, 0, 1, 1], [], []>} : vector<8x16xbf16>, vector<16x8xbf16>, vector<8x8xf32> -> vector<8x8xf32>
    %170 = arith.truncf %169 : vector<8x8xf32> to vector<8x8xbf16>
    %c0_63 = arith.constant 0 : index
    %c24 = arith.constant 24 : index
    %171 = vector.load %arg11[%c0_63, %c24] : memref<8x32xbf16, #tpu.memory_space<vmem>>, vector<8x8xbf16>
    tpu.vector_store %arg11[%c0_63, %c24], %170 {strides = array<i32>} : memref<8x32xbf16, #tpu.memory_space<vmem>>, vector<8x8xbf16>,
    %c0_64 = arith.constant 0 : index
    %c0_65 = arith.constant 0 : index
    %172 = vector.load %arg9[%c0_64, %c0_65] : memref<1x32xf32, #tpu.memory_space<vmem>>, vector<1x32xf32>
    %173 = vector.broadcast %172 : vector<1x32xf32> to vector<8x32xf32>
    %174 = arith.addf %1, %173 : vector<8x32xf32>
    %c0_66 = arith.constant 0 : index
    %c0_67 = arith.constant 0 : index
    %175 = vector.load %arg11[%c0_66, %c0_67] : memref<8x32xbf16, #tpu.memory_space<vmem>>, vector<8x32xbf16>
    %c0_68 = arith.constant 0 : index
    %c0_69 = arith.constant 0 : index
    %176 = vector.load %arg8[%c0_68, %c0_69] : memref<32x32xbf16, #tpu.memory_space<vmem>>, vector<32x32xbf16>
    %cst_70 = arith.constant dense<0.000000e+00> : vector<8x32xf32>
    %177 = tpu.matmul %175, %176, %cst_70 {dimension_numbers = #tpu.dot_dimension_numbers<[1], [0], [0], [1], [0, 0, 1, 1], [], []>} : vector<8x32xbf16>, vector<32x32xbf16>, vector<8x32xf32> -> vector<8x32xf32>
    %178 = arith.addf %174, %177 : vector<8x32xf32>
    %c0_71 = arith.constant 0 : index
    %c0_72 = arith.constant 0 : index
    %c0_73 = arith.constant 0 : index
    %179 = vector.load %arg10[%c0_71, %c0_72, %c0_73] : memref<1x8x32xf32, #tpu.memory_space<vmem>>, vector<1x8x32xf32>
    %180 = vector.shape_cast %179 : vector<1x8x32xf32> to vector<8x32xf32>
    %181 = vector.shape_cast %178 : vector<8x32xf32> to vector<1x8x32xf32>
    tpu.vector_store %arg10[%c0_71, %c0_72, %c0_73], %181 {strides = array<i32>} : memref<1x8x32xf32, #tpu.memory_space<vmem>>, vector<1x8x32xf32>,
    return
  }
  func.func @transform_0(%arg0: i32, %arg1: i32) -> (i32, i32, i32) {
    %c0_i32 = arith.constant 0 : i32
    %c0_i32_0 = arith.constant 0 : i32
    return %arg0, %arg1, %c0_i32 : i32, i32, i32
  }
  func.func @transform_1(%arg0: i32, %arg1: i32) -> (i32, i32, i32) {
    %c0_i32 = arith.constant 0 : i32
    %c0_i32_0 = arith.constant 0 : i32
    %c0_i32_1 = arith.constant 0 : i32
    return %arg0, %c0_i32, %c0_i32_0 : i32, i32, i32
  }
  func.func @transform_2(%arg0: i32, %arg1: i32) -> (i32, i32) {
    %c0_i32 = arith.constant 0 : i32
    %c0_i32_0 = arith.constant 0 : i32
    %c0_i32_1 = arith.constant 0 : i32
    return %c0_i32, %c0_i32_0 : i32, i32
  }
  func.func @transform_3(%arg0: i32, %arg1: i32) -> (i32, i32) {
    %c0_i32 = arith.constant 0 : i32
    %c0_i32_0 = arith.constant 0 : i32
    %c0_i32_1 = arith.constant 0 : i32
    return %c0_i32, %c0_i32_0 : i32, i32
  }
  func.func @transform_4(%arg0: i32, %arg1: i32) -> (i32, i32) {
    %c0_i32 = arith.constant 0 : i32
    %c0_i32_0 = arith.constant 0 : i32
    %c0_i32_1 = arith.constant 0 : i32
    return %c0_i32, %c0_i32_0 : i32, i32
  }
  func.func @transform_5(%arg0: i32, %arg1: i32) -> (i32, i32) {
    %c0_i32 = arith.constant 0 : i32
    %c0_i32_0 = arith.constant 0 : i32
    %c0_i32_1 = arith.constant 0 : i32
    return %c0_i32, %c0_i32_0 : i32, i32
  }
  func.func @transform_6(%arg0: i32, %arg1: i32) -> (i32, i32) {
    %c0_i32 = arith.constant 0 : i32
    %c0_i32_0 = arith.constant 0 : i32
    %c0_i32_1 = arith.constant 0 : i32
    return %c0_i32, %c0_i32_0 : i32, i32
  }
  func.func @transform_7(%arg0: i32, %arg1: i32) -> (i32, i32) {
    %c0_i32 = arith.constant 0 : i32
    %c0_i32_0 = arith.constant 0 : i32
    %c0_i32_1 = arith.constant 0 : i32
    return %c0_i32, %c0_i32_0 : i32, i32
  }
  func.func @transform_8(%arg0: i32, %arg1: i32) -> (i32, i32, i32) {
    %c0_i32 = arith.constant 0 : i32
    %c0_i32_0 = arith.constant 0 : i32
    return %arg0, %arg1, %c0_i32 : i32, i32, i32
  }
}

module attributes {stable_mosaic.version = 11 : i64} {
  func.func @kernel(%arg0: i32, %arg1: i32, %arg2: memref<32x32xf32, #tpu.memory_space<vmem>>, %arg3: memref<1x32xf32, #tpu.memory_space<vmem>>, %arg4: memref<1x32xf32, #tpu.memory_space<vmem>>, %arg5: memref<32x128xbf16, #tpu.memory_space<vmem>>, %arg6: memref<1x128xf32, #tpu.memory_space<vmem>>, %arg7: memref<128x32xbf16, #tpu.memory_space<vmem>>, %arg8: memref<1x32xf32, #tpu.memory_space<vmem>>, %arg9: memref<32x32xf32, #tpu.memory_space<vmem>>, %arg10: memref<32x32xbf16, #tpu.memory_space<vmem>>) attributes {dimension_semantics = [#tpu.dimension_semantics<parallel>, #tpu.dimension_semantics<arbitrary>], iteration_bounds = array<i64: 1, 2>, scalar_prefetch = 0 : i64, scratch_operands = 1 : i64, tpu.core_type = #tpu.core_type<tc>, window_params = [{transform_indices = @transform_0, window_bounds = array<i64: 32, 32>}, {pipeline_mode = #tpu.pipeline_mode<synchronous>, transform_indices = @transform_1, window_bounds = array<i64: 1, 32>}, {pipeline_mode = #tpu.pipeline_mode<synchronous>, transform_indices = @transform_2, window_bounds = array<i64: 1, 32>}, {transform_indices = @transform_3, window_bounds = array<i64: 32, 128>}, {transform_indices = @transform_4, window_bounds = array<i64: 1, 128>}, {transform_indices = @transform_5, window_bounds = array<i64: 128, 32>}, {pipeline_mode = #tpu.pipeline_mode<synchronous>, transform_indices = @transform_6, window_bounds = array<i64: 1, 32>}, {transform_indices = @transform_7, window_bounds = array<i64: 32, 32>}]} {
    %c0_i32 = arith.constant 0 : i32
    %0 = arith.cmpi eq, %arg1, %c0_i32 : i32
    %1 = arith.extui %0 : i1 to i32
    %c0_i32_0 = arith.constant 0 : i32
    %2 = arith.cmpi ne, %1, %c0_i32_0 : i32
    scf.if %2 {
      %c0_14 = arith.constant 0 : index
      %c0_15 = arith.constant 0 : index
      %17 = vector.load %arg2[%c0_14, %c0_15] : memref<32x32xf32, #tpu.memory_space<vmem>>, vector<32x32xf32>
      %c0_16 = arith.constant 0 : index
      %c0_17 = arith.constant 0 : index
      %18 = vector.load %arg3[%c0_16, %c0_17] : memref<1x32xf32, #tpu.memory_space<vmem>>, vector<1x32xf32>
      %c0_18 = arith.constant 0 : index
      %c0_19 = arith.constant 0 : index
      %19 = vector.load %arg4[%c0_18, %c0_19] : memref<1x32xf32, #tpu.memory_space<vmem>>, vector<1x32xf32>
      %cst_20 = arith.constant dense<0.000000e+00> : vector<32xf32>
      %20 = vector.multi_reduction <add>, %17, %cst_20 [1] : vector<32x32xf32> to vector<32xf32>
      %21 = vector.shape_cast %20 : vector<32xf32> to vector<32x1xf32>
      %cst_21 = arith.constant 3.200000e+01 : f32
      %22 = vector.broadcast %cst_21 : f32 to vector<32x1xf32>
      %23 = arith.divf %21, %22 : vector<32x1xf32>
      %24 = vector.broadcast %23 : vector<32x1xf32> to vector<32x32xf32>
      %25 = arith.subf %17, %24 : vector<32x32xf32>
      %26 = arith.mulf %25, %25 : vector<32x32xf32>
      %cst_22 = arith.constant dense<0.000000e+00> : vector<32xf32>
      %27 = vector.multi_reduction <add>, %26, %cst_22 [1] : vector<32x32xf32> to vector<32xf32>
      %28 = vector.shape_cast %27 : vector<32xf32> to vector<32x1xf32>
      %cst_23 = arith.constant 3.100000e+01 : f32
      %29 = vector.broadcast %cst_23 : f32 to vector<32x1xf32>
      %30 = arith.divf %28, %29 : vector<32x1xf32>
      %31 = vector.broadcast %18 : vector<1x32xf32> to vector<32x32xf32>
      %32 = arith.mulf %31, %25 : vector<32x32xf32>
      %33 = math.sqrt %30 : vector<32x1xf32>
      %cst_24 = arith.constant 9.99999997E-7 : f32
      %34 = vector.broadcast %cst_24 : f32 to vector<32x1xf32>
      %35 = arith.addf %33, %34 : vector<32x1xf32>
      %36 = vector.broadcast %35 : vector<32x1xf32> to vector<32x32xf32>
      %37 = arith.divf %32, %36 : vector<32x32xf32>
      %38 = vector.broadcast %19 : vector<1x32xf32> to vector<32x32xf32>
      %39 = arith.addf %37, %38 : vector<32x32xf32>
      %40 = arith.truncf %39 : vector<32x32xf32> to vector<32x32xbf16>
      %c0_25 = arith.constant 0 : index
      %c0_26 = arith.constant 0 : index
      %41 = vector.load %arg10[%c0_25, %c0_26] : memref<32x32xbf16, #tpu.memory_space<vmem>>, vector<32x32xbf16>
      tpu.vector_store %arg10[%c0_25, %c0_26], %40 {strides = array<i32>} : memref<32x32xbf16, #tpu.memory_space<vmem>>, vector<32x32xbf16>,
      %c0_27 = arith.constant 0 : index
      %c0_28 = arith.constant 0 : index
      %42 = vector.load %arg8[%c0_27, %c0_28] : memref<1x32xf32, #tpu.memory_space<vmem>>, vector<1x32xf32>
      %43 = vector.broadcast %42 : vector<1x32xf32> to vector<32x32xf32>
      %44 = arith.addf %17, %43 : vector<32x32xf32>
      %c0_29 = arith.constant 0 : index
      %c0_30 = arith.constant 0 : index
      %45 = vector.load %arg9[%c0_29, %c0_30] : memref<32x32xf32, #tpu.memory_space<vmem>>, vector<32x32xf32>
      tpu.vector_store %arg9[%c0_29, %c0_30], %44 {strides = array<i32>} : memref<32x32xf32, #tpu.memory_space<vmem>>, vector<32x32xf32>,
    } else {
    }
    %c0 = arith.constant 0 : index
    %c0_1 = arith.constant 0 : index
    %3 = vector.load %arg10[%c0, %c0_1] : memref<32x32xbf16, #tpu.memory_space<vmem>>, vector<32x32xbf16>
    %c0_2 = arith.constant 0 : index
    %c0_3 = arith.constant 0 : index
    %4 = vector.load %arg5[%c0_2, %c0_3] : memref<32x128xbf16, #tpu.memory_space<vmem>>, vector<32x128xbf16>
    %cst = arith.constant dense<0.000000e+00> : vector<32x128xf32>
    %5 = tpu.matmul %3, %4, %cst {dimension_numbers = #tpu.dot_dimension_numbers<[1], [0], [0], [1], [0, 0, 1, 1], [], []>} : vector<32x32xbf16>, vector<32x128xbf16>, vector<32x128xf32> -> vector<32x128xf32>
    %c0_4 = arith.constant 0 : index
    %c0_5 = arith.constant 0 : index
    %6 = vector.load %arg6[%c0_4, %c0_5] : memref<1x128xf32, #tpu.memory_space<vmem>>, vector<1x128xf32>
    %7 = vector.broadcast %6 : vector<1x128xf32> to vector<32x128xf32>
    %8 = arith.addf %5, %7 : vector<32x128xf32>
    %cst_6 = arith.constant 0.000000e+00 : f32
    %9 = vector.broadcast %cst_6 : f32 to vector<32x128xf32>
    %10 = arith.maximumf %8, %9 : vector<32x128xf32>
    %11 = arith.truncf %10 : vector<32x128xf32> to vector<32x128xbf16>
    %c0_7 = arith.constant 0 : index
    %c0_8 = arith.constant 0 : index
    %12 = vector.load %arg9[%c0_7, %c0_8] : memref<32x32xf32, #tpu.memory_space<vmem>>, vector<32x32xf32>
    %c0_9 = arith.constant 0 : index
    %c0_10 = arith.constant 0 : index
    %13 = vector.load %arg7[%c0_9, %c0_10] : memref<128x32xbf16, #tpu.memory_space<vmem>>, vector<128x32xbf16>
    %cst_11 = arith.constant dense<0.000000e+00> : vector<32x32xf32>
    %14 = tpu.matmul %11, %13, %cst_11 {dimension_numbers = #tpu.dot_dimension_numbers<[1], [0], [0], [1], [0, 0, 1, 1], [], []>} : vector<32x128xbf16>, vector<128x32xbf16>, vector<32x32xf32> -> vector<32x32xf32>
    %15 = arith.addf %12, %14 : vector<32x32xf32>
    %c0_12 = arith.constant 0 : index
    %c0_13 = arith.constant 0 : index
    %16 = vector.load %arg9[%c0_12, %c0_13] : memref<32x32xf32, #tpu.memory_space<vmem>>, vector<32x32xf32>
    tpu.vector_store %arg9[%c0_12, %c0_13], %15 {strides = array<i32>} : memref<32x32xf32, #tpu.memory_space<vmem>>, vector<32x32xf32>,
    return
  }
  func.func @transform_0(%arg0: i32, %arg1: i32) -> (i32, i32) {
    %c0_i32 = arith.constant 0 : i32
    %c0_i32_0 = arith.constant 0 : i32
    return %arg0, %c0_i32 : i32, i32
  }
  func.func @transform_1(%arg0: i32, %arg1: i32) -> (i32, i32) {
    %c0_i32 = arith.constant 0 : i32
    %c0_i32_0 = arith.constant 0 : i32
    %c0_i32_1 = arith.constant 0 : i32
    return %c0_i32, %c0_i32_0 : i32, i32
  }
  func.func @transform_2(%arg0: i32, %arg1: i32) -> (i32, i32) {
    %c0_i32 = arith.constant 0 : i32
    %c0_i32_0 = arith.constant 0 : i32
    %c0_i32_1 = arith.constant 0 : i32
    return %c0_i32, %c0_i32_0 : i32, i32
  }
  func.func @transform_3(%arg0: i32, %arg1: i32) -> (i32, i32) {
    %c0_i32 = arith.constant 0 : i32
    %c0_i32_0 = arith.constant 0 : i32
    return %c0_i32, %arg1 : i32, i32
  }
  func.func @transform_4(%arg0: i32, %arg1: i32) -> (i32, i32) {
    %c0_i32 = arith.constant 0 : i32
    %c0_i32_0 = arith.constant 0 : i32
    return %c0_i32, %arg1 : i32, i32
  }
  func.func @transform_5(%arg0: i32, %arg1: i32) -> (i32, i32) {
    %c0_i32 = arith.constant 0 : i32
    %c0_i32_0 = arith.constant 0 : i32
    return %arg1, %c0_i32 : i32, i32
  }
  func.func @transform_6(%arg0: i32, %arg1: i32) -> (i32, i32) {
    %c0_i32 = arith.constant 0 : i32
    %c0_i32_0 = arith.constant 0 : i32
    %c0_i32_1 = arith.constant 0 : i32
    return %c0_i32, %c0_i32_0 : i32, i32
  }
  func.func @transform_7(%arg0: i32, %arg1: i32) -> (i32, i32) {
    %c0_i32 = arith.constant 0 : i32
    %c0_i32_0 = arith.constant 0 : i32
    return %arg0, %c0_i32 : i32, i32
  }
}

</mosaic_0001>

<bundles_post_ra>
// kernel: decoder_layer.5
= control target key start
LH: loop header
LB: loop body
LE: loop exit
PB: predicated region body
PF: predicated region fallthrough
CT: control target
= control target key end

     0   :  { %s1071_s24 = smov 0   ;;  %s1073_s25 = smov 0   ;;  %s1264_s0 = inlined_call_operand.vmem [shape: f32[32,32], index: 0, kind: input, shape index: {}, may-alias: {0,7}]   ;;  %s1265_s1 = inlined_call_operand.vmem [shape: f32[1,32], index: 1, kind: input, shape index: {}]   ;;  %s1266_s2 = inlined_call_operand.vmem [shape: f32[1,32], index: 2, kind: input, shape index: {}]   ;;  %s1267_s3 = inlined_call_operand.vmem [shape: bf16[32,256], index: 3, kind: input, shape index: {}]   ;;  %s1268_s4 = inlined_call_operand.vmem [shape: f32[1,256], index: 4, kind: input, shape index: {}]   ;;  %s1269_s5 = inlined_call_operand.vmem [shape: bf16[256,32], index: 5, kind: input, shape index: {}]   ;;  %s1270_s6 = inlined_call_operand.vmem [shape: f32[1,32], index: 6, kind: input, shape index: {}]   ;;  %s1271_s7 = inlined_call_operand.vmem [shape: f32[32,32], index: 7, kind: output, shape index: {}, may-alias: {0,7}]  }
   0x1   :  { %s1075_s26 = smov 0   ;;  %s1077_s27 = smov 0  }
   0x2   :  { %s1079_s28 = smov 0  }
   0x3 LB: > { %s26_s29 = sadd.s32 1, %s1025_s27  ;;  %p111_p1 = scmp.ne.s32.totalorder %s1017_s25, %s1013_s24  ;;  %s1029_s28 = sphi %s1079_s28, %s17_s28   ;;  %s1025_s27 = sphi %s1077_s27, %s1275_s27   ;;  %s1021_s26 = sphi %s1075_s26, %s1274_s26   ;;  %s1017_s25 = sphi %s1073_s25, %s1273_s25   ;;  %s1013_s24 = sphi %s1071_s24, %s1272_s24  }
   0x4   : > { %p27_p0 = scmp.ge.s32.totalorder %s26_s29, 2  ;;  %p112_p2 = scmp.eq.s32.totalorder %s1029_s28, 0 }
   0x5   : > { %s104_s8 = sadd.s32 1, %s1017_s25  ;;  %p855_p5 = scmp.ge.s32.totalorder %s1029_s28, 2 }
   0x6   : > { %s1277_s29 = smov (%p27_p0, %s26_s29), 0  ;;  %p113_p3 = por %p112_p2, %p111_p1 }
   0x7   : > { %s101_s30 = ssub.s32 %s1025_s27, %s1277_s29  ;;  %254 = sbr.rel (%p855_p5) target bundleno = 21 (0x15), region = 32 }
   0x8   : > { %p102_p4 = scmp.eq.s32.totalorder %s101_s30, 0 }
   0xa   : > { %s1106_s9 = scalar_select %p102_p4, %s1017_s25, %s104_s8  }
   0xe   : > { %257 = sbr.rel (!%p113_p3) target bundleno = 21 (0x15), region = 36  ;;  %s259_s10 = sand.u32 (%p113_p3), 1, %s1017_s25  }
   0xf   : > { %s857_s11 = sshll.u32 (%p113_p3), %s1025_s27, 2  ;;  %s856_s12 = sshll.u32 (%p113_p3), %s259_s10, 4 }
  0x10   : > { %s263_s15 = scalar_lea.vmem (%p113_p3), %s1267_s3, %s857_s11  ;;  %s261_s16 = scalar_lea.vmem (%p113_p3), [#allocation3], %s856_s12 }
  0x11   : > { %v279_v0 = vld [vmem:[%s263_s15] sm:$0xf] (%p113_p3)  ;;  %v281_v1 = vld [vmem:[%s263_s15 + $0x8] sm:$0xf] (%p113_p3)  ;;  %v283_v2 = vld [vmem:[%s263_s15 + $0x10] sm:$0xf] (%p113_p3) }
  0x12   : > { %280 = vst [vmem:[%s261_s16] sm:$0xf] (%p113_p3), %v279_v0  ;;  %282 = vst [vmem:[%s261_s16 + $0x4] sm:$0xf] (%p113_p3), %v281_v1  ;;  %v285_v3 = vld [vmem:[%s263_s15 + $0x18] sm:$0xf] (%p113_p3) }
  0x13   : > { %284 = vst [vmem:[%s261_s16 + $0x8] sm:$0xf] (%p113_p3), %v283_v2  ;;  %286 = vst [vmem:[%s261_s16 + $0xc] sm:$0xf] (%p113_p3), %v285_v3 }
  0x15 PF: > { %p858_p6 = scmp.ge.s32.totalorder %s1029_s28, 1  ;;  %p331_p7 = scmp.lt.s32.totalorder %s1029_s28, 3 }
  0x17   : > { %p332_p8 = pnand %p858_p6, %p331_p7 }
  0x18   : > { %s338_s17 = sand.u32 (!%p332_p8), 1, %s1013_s24   ;;  %p388_p9 = scmp.lt.s32.totalorder (!%p332_p8), %s1021_s26, 1 }
  0x19   : > { %335 = sbr.rel (%p332_p8) target bundleno = 821 (0x335), region = 85  ;;  %s1118_s18 = sshll.u32 (!%p332_p8), %s338_s17, 4 }
  0x1a   : > { %s860_s19 = sshll.u32 (!%p332_p8), %s1021_s26, 4  ;;  %s340_s24 = scalar_lea.vmem (!%p332_p8), [#allocation3], %s1118_s18 }
  0x1b   : > { %p392_p10 = scmp.lt.s32.totalorder (!%p332_p8), %s860_s19, 31  ;;  %p862_p11 = scmp.ne.s32.totalorder (!%p332_p8), %s1021_s26, 0 }
  0x20   : > { %s1122_s20 = scalar_select %p388_p9, %s1021_s26, 1 }
  0x21   : > { %s1279_s19 = smov (!%p392_p10, %s860_s19), 31  ;;  %407 = sbr.rel (%p862_p11) target bundleno = 372 (0x174), region = 93 }
  0x22   : > { %s390_s23 = scalar_lea.vmem %s1268_s4, %s1122_s20  ;;  %s861_s30 = sshll.u32 %s1279_s19, 2  ;;  %v408_v4 = vld [vmem:[%s1264_s0] sm:$0xff] (!%p862_p11)  ;;  %vm414_vm0 = vcmask (!%p862_p11), 261120   ;;  %v410_v6 = vld [vmem:[%s1264_s0 + $0x10] sm:$0xff] (!%p862_p11)  ;;  %v409_v11 = vld [vmem:[%s1264_s0 + $0x8] sm:$0xff] (!%p862_p11) }
  0x23   : > { %s1131_s11 = scalar_lea.vmem %s1269_s5, %s861_s30  ;;  %v865_v5 = vld [vmem:[%s1270_s6] ss:$0 sm:$0xff] (!%p862_p11)  ;;  %v415_v7 = vsel (!%p862_p11), %vm414_vm0, %v408_v4, 0.0  ;;  %v421_v9 = vsel (!%p862_p11), %vm414_vm0, %v410_v6, 0.0  ;;  %v411_v12 = vld [vmem:[%s1264_s0 + $0x18] sm:$0xff] (!%p862_p11)  ;;  %v418_v15 = vsel (!%p862_p11), %vm414_vm0, %v409_v11, 0.0 }
  0x24   : > { %v528_v8 = vadd.f32 (!%p862_p11), %v865_v5, %v408_v4  ;;  %v530_v10 = vadd.f32 (!%p862_p11), %v865_v5, %v410_v6  ;;  %416 = vadd.xlane.f32.xlu0 (!%p862_p11), %v415_v7  ;;  %422 = vadd.xlane.f32.xlu1 (!%p862_p11), %v421_v9  ;;  %v529_v13 = vadd.f32 (!%p862_p11), %v865_v5, %v409_v11  ;;  %v424_v16 = vsel (!%p862_p11), %vm414_vm0, %v411_v12, 0.0 }
  0x25   : > { %v531_v14 = vadd.f32 (!%p862_p11), %v865_v5, %v411_v12  ;;  %v863_v5 = vld [vmem:[%s1265_s1] ss:$0 sm:$0xff] (!%p862_p11) }
  0x26   : > { %532 = vst.msk [vmem:[%s1271_s7] sm:$0xff] (!%p862_p11), %vm414_vm0, %v528_v8  ;;  %534 = vst.msk [vmem:[%s1271_s7 + $0x10] sm:$0xff] (!%p862_p11), %vm414_vm0, %v530_v10 }
  0x27   : > { %533 = vst.msk [vmem:[%s1271_s7 + $0x8] sm:$0xff] (!%p862_p11), %vm414_vm0, %v529_v13  ;;  %535 = vst.msk [vmem:[%s1271_s7 + $0x18] sm:$0xff] (!%p862_p11), %vm414_vm0, %v531_v14 }
  0x28   : > { %419 = vadd.xlane.f32.xlu0 %v418_v15  ;;  %425 = vadd.xlane.f32.xlu1 %v424_v16 }
  0xb1   : > { %v417_v17 = vpop.xlane.xlu0 %416  ;;  %v423_v18 = vpop.xlane.xlu1 %422 }
  0xb2   : > { %v428_v19 = vmul.f32 0.03125, %v417_v17  ;;  %v430_v20 = vmul.f32 0.03125, %v423_v18 }
  0xb4   : > { %v1170_v21 = vsub.f32 %v408_v4, %v428_v19  ;;  %v1172_v22 = vsub.f32 %v410_v6, %v430_v20 }
  0xb5   : > { %v420_v23 = vpop.xlane.xlu0 %419  ;;  %v426_v24 = vpop.xlane.xlu1 %425 }
  0xb6   : > { %v429_v25 = vmul.f32 0.03125, %v420_v23  ;;  %v431_v26 = vmul.f32 0.03125, %v426_v24  ;;  %v436_v27 = vmul.f32 %v1170_v21, %v1170_v21  ;;  %v438_v28 = vmul.f32 %v1172_v22, %v1172_v22 }
  0xb7   : > { %v463_v7 = vmul.f32 %v863_v5, %v1170_v21  ;;  %v465_v13 = vmul.f32 %v863_v5, %v1172_v22 }
  0xb8   : > { %v1178_v29 = vsub.f32 %v409_v11, %v429_v25  ;;  %v1180_v30 = vsub.f32 %v411_v12, %v431_v26  ;;  %v440_v31 = vsel %vm414_vm0, %v436_v27, 0.0  ;;  %v446_v34 = vsel %vm414_vm0, %v438_v28, 0.0  ;;  %v864_v11 = vld [vmem:[%s1266_s2] ss:$0 sm:$0xff] }
  0xb9   : > { %441 = vadd.xlane.f32.xlu0 %v440_v31 }
  0xba   : > { %v437_v32 = vmul.f32 %v1178_v29, %v1178_v29  ;;  %v439_v33 = vmul.f32 %v1180_v30, %v1180_v30  ;;  %v464_v8 = vmul.f32 %v863_v5, %v1178_v29  ;;  %v466_v15 = vmul.f32 %v863_v5, %v1180_v30 }
  0xbc   : > { %v443_v35 = vsel %vm414_vm0, %v437_v32, 0.0  ;;  %v449_v36 = vsel %vm414_vm0, %v439_v33, 0.0 }
  0xbd   : > { %444 = vadd.xlane.f32.xlu1 %v443_v35  ;;  %447 = vadd.xlane.f32.xlu0 %v446_v34 }
  0xc1   : > { %450 = vadd.xlane.f32.xlu1 %v449_v36 }
 0x146   : > { %v442_v37 = vpop.xlane.xlu0 %441 }
 0x147   : > { %v453_v38 = vmul.f32 0.032258064, %v442_v37 }
 0x149   : > { %965 = vrsqrt.f32 %v453_v38  ;;  %vm469_vm1 = vcmp.eq.f32.partialorder %v453_v38, inf  ;;  %v472_v47 = vand.u32 2147483648, %v453_v38  ;;  %vm471_vm2 = vcmp.eq.f32.partialorder %v453_v38, 0.0 }
 0x14a   : > { %v445_v39 = vpop.xlane.xlu1 %444  ;;  %v448_v41 = vpop.xlane.xlu0 %447 }
 0x14b   : > { %v454_v40 = vmul.f32 0.032258064, %v445_v39  ;;  %v455_v42 = vmul.f32 0.032258064, %v448_v41 }
 0x14d   : > { %967 = vrsqrt.f32 %v454_v40  ;;  %vm476_vm3 = vcmp.eq.f32.partialorder %v454_v40, inf  ;;  %v479_v54 = vand.u32 2147483648, %v454_v40  ;;  %vm478_vm4 = vcmp.eq.f32.partialorder %v454_v40, 0.0 }
 0x14e   : > { %969 = vrsqrt.f32 %v455_v42  ;;  %v451_v43 = vpop.xlane.xlu1 %450  ;;  %vm483_vm5 = vcmp.eq.f32.partialorder %v455_v42, inf  ;;  %v486_v57 = vand.u32 2147483648, %v455_v42  ;;  %vm485_vm6 = vcmp.eq.f32.partialorder %v455_v42, 0.0 }
 0x14f   : > { %v456_v44 = vmul.f32 0.032258064, %v451_v43 }
 0x151   : > { %971 = vrsqrt.f32 %v456_v44  ;;  %vm490_vm7 = vcmp.eq.f32.partialorder %v456_v44, inf  ;;  %v493_v1 = vand.u32 2147483648, %v456_v44  ;;  %vm492_vm8 = vcmp.eq.f32.partialorder %v456_v44, 0.0 }
 0x153   : > { %v966_v45 = vpop.eup %965 }
 0x154   : > { %v468_v46 = vmul.f32 %v966_v45, %v453_v38 }
 0x156   : > { %v470_v49 = vsel %vm469_vm1, %v453_v38, %v468_v46 }
 0x157   : > { %v968_v48 = vpop.eup %967  ;;  %v473_v51 = vsel %vm471_vm2, %v472_v47, %v470_v49 }
 0x158   : > { %v970_v50 = vpop.eup %969  ;;  %v475_v52 = vmul.f32 %v968_v48, %v454_v40  ;;  %v495_v53 = vadd.f32 1e-06, %v473_v51 }
 0x159   : > { %v482_v55 = vmul.f32 %v970_v50, %v455_v42 }
 0x15a   : > { %v477_v56 = vsel %vm476_vm3, %v454_v40, %v475_v52  ;;  %973 = vrcp.f32 %v495_v53 }
 0x15b   : > { %v972_v58 = vpop.eup %971  ;;  %v480_v59 = vsel %vm478_vm4, %v479_v54, %v477_v56  ;;  %v484_v60 = vsel %vm483_vm5, %v455_v42, %v482_v55 }
 0x15c   : > { %v496_v61 = vadd.f32 1e-06, %v480_v59  ;;  %v487_v62 = vsel %vm485_vm6, %v486_v57, %v484_v60  ;;  %v489_v63 = vmul.f32 %v972_v58, %v456_v44 }
 0x15d   : > { %v497_v0 = vadd.f32 1e-06, %v487_v62 }
 0x15e   : > { %975 = vrcp.f32 %v496_v61  ;;  %v491_v2 = vsel %vm490_vm7, %v456_v44, %v489_v63 }
 0x15f   : > { %977 = vrcp.f32 %v497_v0  ;;  %v494_v3 = vsel %vm492_vm8, %v493_v1, %v491_v2 }
 0x160   : > { %v498_v4 = vadd.f32 1e-06, %v494_v3 }
 0x162   : > { %979 = vrcp.f32 %v498_v4 }
 0x164   : > { %v974_v6 = vpop.eup %973 }
 0x165   : > { %v500_v9 = vmul.f32 %v974_v6, %v463_v7 }
 0x167   : > { %v513_v16 = vadd.f32 %v864_v11, %v500_v9 }
 0x168   : > { %v976_v10 = vpop.eup %975 }
 0x169   : > { %v978_v12 = vpop.eup %977  ;;  %v502_v14 = vmul.f32 %v976_v10, %v464_v8 }
 0x16a   : > { %v504_v18 = vmul.f32 %v978_v12, %v465_v13 }
 0x16b   : > { %v514_v17 = vadd.f32 %v864_v11, %v502_v14 }
 0x16c   : > { %v980_v19 = vpop.eup %979  ;;  %v515_v23 = vadd.f32 %v864_v11, %v504_v18 }
 0x16d   : > { %v517_v20 = vpack.c.bf16 %v514_v17, %v513_v16  ;;  %v506_v21 = vmul.f32 %v980_v19, %v466_v15 }
 0x16f   : > { %519 = vst.msk [vmem:[#allocation2] sm:$0xff] %vm414_vm0, %v517_v20  ;;  %v516_v24 = vadd.f32 %v864_v11, %v506_v21 }
 0x171   : > { %v518_v25 = vpack.c.bf16 %v516_v24, %v515_v23 }
 0x173   : > { %520 = vst.msk [vmem:[#allocation2 + $0x8] sm:$0xff] %vm414_vm0, %v518_v25 }
 0x174 PF: > { %v981_v22 = vld [vmem:[%s340_s24] sm:$0xff]   ;;  %vm561_vm9 = vcmask 261120   ;;  %v982_v26 = vld [vmem:[%s340_s24 + $0x8] sm:$0xff]  }
 0x175   : > { %897 = vmatprep.subr.bf16.mxu0 %v981_v22  ;;  %v983_v28 = vld [vmem:[%s1131_s11] sm:$0xff]   ;;  %v984_v29 = vld [vmem:[%s1131_s11 + $0x8] sm:$0xff]   ;;  %v985_v31 = vld [vmem:[%s1131_s11 + $0x10] sm:$0xff]  }
 0x176   : > { %v536_v27 = vld [vmem:[#allocation2] sm:$0xff]  ;;  %898 = vmatpush3.bf16.msra.mxu0 %v981_v22  ;;  %905 = vmatprep.subr.bf16.mxu1 %v983_v28  ;;  %v986_v32 = vld [vmem:[%s1131_s11 + $0x18] sm:$0xff]   ;;  %v988_v34 = vld [vmem:[%s1131_s11 + $0x28] sm:$0xff]  }
 0x177   : > { %901 = vmatprep.mubr.msk.bf16.mxu0 %vm561_vm9, %v536_v27  ;;  %899 = vmatprep.subr.bf16.mxu0 %v982_v26  ;;  %v987_v33 = vld [vmem:[%s1131_s11 + $0x20] sm:$0xff]   ;;  %v989_v35 = vld [vmem:[%s1131_s11 + $0x30] sm:$0xff]   ;;  %v990_v36 = vld [vmem:[%s1131_s11 + $0x38] sm:$0xff]  }
 0x178   : > { %906 = vmatpush3.bf16.msra.mxu1 %v983_v28  ;;  %v866_v37 = vld [vmem:[%s390_s23] ss:$0 sm:$0xff] }
 0x179   : > { %907 = vmatprep.subr.bf16.mxu1 %v984_v29  ;;  %v625_v52 = vld [vmem:[%s1271_s7 + $0x10] sm:$0xff]  ;;  %v623_v53 = vld [vmem:[%s1271_s7] sm:$0xff] }
 0x17a   : > { %v537_v30 = vld [vmem:[#allocation2 + $0x8] sm:$0xff]  ;;  %900 = vmatpush3.bf16.msra.mxu0 %v982_v26  ;;  %v626_v55 = vld [vmem:[%s1271_s7 + $0x18] sm:$0xff] }
 0x17b   : > { %v624_v58 = vld [vmem:[%s1271_s7 + $0x8] sm:$0xff] }
 0x17c   : > { %908 = vmatpush3.bf16.msra.mxu1 %v984_v29 }
 0x17d   : > { %902 = vmatmul.mubr.msk.bf16.vlgmr.msra.gmra.mrb[0].mxu0 %vm561_vm9, %v537_v30  ;;  %909 = vmatprep.subr.bf16.mxu1 %v985_v31 }
 0x180   : > { %910 = vmatpush3.bf16.msra.mxu1 %v985_v31 }
 0x181   : > { %911 = vmatprep.subr.bf16.mxu1 %v986_v32 }
 0x184   : > { %912 = vmatpush3.bf16.msra.mxu1 %v986_v32 }
 0x185   : > { %913 = vmatprep.subr.bf16.mxu1 %v987_v33 }
 0x188   : > { %914 = vmatpush3.bf16.msra.mxu1 %v987_v33 }
 0x189   : > { %915 = vmatprep.subr.bf16.mxu1 %v988_v34 }
 0x18c   : > { %916 = vmatpush3.bf16.msra.mxu1 %v988_v34 }
 0x18d   : > { %917 = vmatprep.subr.bf16.mxu1 %v989_v35 }
 0x190   : > { %918 = vmatpush3.bf16.msra.mxu1 %v989_v35 }
 0x191   : > { %919 = vmatprep.subr.bf16.mxu1 %v990_v36 }
 0x194   : > { %920 = vmatpush3.bf16.msra.mxu1 %v990_v36 }
 0x250   : > { %v903_v38 = vpop.f32.mrb[0].mxu0 }
 0x251   : > { %v611_v39 = vadd.f32 %v903_v38, %v866_v37  ;;  %v602_v40 = vpop.f32.mrb[1].mxu0 }
 0x252   : > { %v603_v41 = vadd.f32 %v866_v37, %v602_v40  ;;  %v904_v42 = vpop.f32.mrb[2].mxu0 }
 0x253   : > { %v614_v43 = vadd.f32 %v904_v42, %v866_v37  ;;  %v605_v44 = vpop.f32.mrb[3].mxu0  ;;  %v619_v46 = vmax.f32 %v611_v39, 0.0 }
 0x254   : > { %v606_v45 = vadd.f32 %v866_v37, %v605_v44  ;;  %v617_v48 = vmax.f32 %v603_v41, 0.0 }
 0x255   : > { %v620_v47 = vmax.f32 %v614_v43, 0.0 }
 0x256   : > { %v618_v49 = vmax.f32 %v606_v45, 0.0 }
 0x257   : > { %v622_v50 = vpack.c.bf16 %v620_v47, %v619_v46 }
 0x258   : > { %v621_v51 = vpack.c.bf16 %v618_v49, %v617_v48 }
 0x25a   : > { %921 = vmatprep.mubr.bf16.mxu1 %v621_v51 }
 0x25b   : > { %922 = vmatmul.mubr.bf16.vlgmr.msra.gmra.mrb[0].mxu1 %v622_v50 }
 0x32e   : > { %v923_v54 = vpop.f32.mrb[0].mxu1 }
 0x32f   : > { %v742_v56 = vadd.f32 %v923_v54, %v625_v52  ;;  %v725_v57 = vpop.f32.mrb[1].mxu1 }
 0x330   : > { %v740_v59 = vadd.f32 %v725_v57, %v623_v53  ;;  %v924_v60 = vpop.f32.mrb[2].mxu1 }
 0x331   : > { %746 = vst.msk [vmem:[%s1271_s7 + $0x10] sm:$0xff] %vm561_vm9, %v742_v56  ;;  %v743_v61 = vadd.f32 %v924_v60, %v626_v55  ;;  %v728_v62 = vpop.f32.mrb[3].mxu1 }
 0x332   : > { %744 = vst.msk [vmem:[%s1271_s7] sm:$0xff] %vm561_vm9, %v740_v59  ;;  %v741_v63 = vadd.f32 %v728_v62, %v624_v58 }
 0x333   : > { %747 = vst.msk [vmem:[%s1271_s7 + $0x18] sm:$0xff] %vm561_vm9, %v743_v61 }
 0x334   : > { %745 = vst.msk [vmem:[%s1271_s7 + $0x8] sm:$0xff] %vm561_vm9, %v741_v63 }
 0x335 PF: > { %s17_s28 = sadd.s32 1, %s1029_s28   ;;  %s1272_s24 = smov %s1017_s25 }
 0x336   : > { %p14_p12 = scmp.ge.s32.totalorder %s17_s28, 4   ;;  %s1273_s25 = smov %s1106_s9 }
 0x337   : > { %s1274_s26 = smov %s1025_s27  ;;  %s1275_s27 = smov %s1277_s29 }
 0x338   :  { %16 = sbr.rel (!%p14_p12) target bundleno = 3 (0x3), region = 137 }

// kernel: decoder_layer.4
= control target key start
LH: loop header
LB: loop body
LE: loop exit
PB: predicated region body
PF: predicated region fallthrough
CT: control target
= control target key end

     0   :  { %s1630_s17 = smov 0   ;;  %s1632_s18 = smov 0   ;;  %s1813_s0 = inlined_call_operand.vmem [shape: f32[2,16,32], index: 0, kind: input, shape index: {}, may-alias: {0,11}]   ;;  %s1814_s1 = inlined_call_operand.vmem [shape: f32[2,16,32], index: 1, kind: input, shape index: {}]   ;;  %s1815_s2 = inlined_call_operand.vmem [shape: f32[1,32], index: 2, kind: input, shape index: {}]   ;;  %s1816_s3 = inlined_call_operand.vmem [shape: f32[1,32], index: 3, kind: input, shape index: {}]   ;;  %s1817_s4 = inlined_call_operand.vmem [shape: bf16[32,32], index: 4, kind: input, shape index: {}]   ;;  %s1818_s5 = inlined_call_operand.vmem [shape: f32[1,32], index: 5, kind: input, shape index: {}]   ;;  %s1819_s6 = inlined_call_operand.vmem [shape: bf16[32,64], index: 6, kind: input, shape index: {}]   ;;  %s1820_s7 = inlined_call_operand.vmem [shape: f32[1,64], index: 7, kind: input, shape index: {}]   ;;  %s1821_s8 = inlined_call_operand.vmem [shape: bf16[32,32], index: 8, kind: input, shape index: {}]   ;;  %s1822_s9 = inlined_call_operand.vmem [shape: f32[1,32], index: 9, kind: input, shape index: {}]   ;;  %s1823_s10 = inlined_call_operand.vmem [shape: s32[2,1,16], index: 10, kind: input, shape index: {}]   ;;  %s1824_s11 = inlined_call_operand.vmem [shape: f32[2,16,32], index: 11, kind: output, shape index: {}, may-alias: {0,11}]  }
   0x1   :  { %s1634_s19 = smov 0   ;;  %s1636_s20 = smov 0  }
   0x2   :  { %s1638_s21 = smov 0  }
   0x3 LB: > { %s30_s22 = sadd.s32 1, %s1547_s19  ;;  %s33_s23 = sadd.s32 1, %s1551_s20  ;;  %s1555_s21 = sphi %s1638_s21, %s21_s21   ;;  %s1551_s20 = sphi %s1636_s20, %s1828_s20   ;;  %s1547_s19 = sphi %s1634_s19, %s1827_s19   ;;  %s1543_s18 = sphi %s1632_s18, %s1826_s18   ;;  %s1539_s17 = sphi %s1630_s17, %s1825_s17  }
   0x4   : > { %p31_p0 = scmp.ge.s32.totalorder %s30_s22, 2  ;;  %p1303_p1 = scmp.ge.s32.totalorder %s1555_s21, 1 }
   0x5   : > { %p374_p2 = scmp.lt.s32.totalorder %s1555_s21, 5 }
   0x6   : > { %s1830_s22 = smov (%p31_p0, %s30_s22), 0  ;;  %s1832_s23 = smov (!%p31_p0, %s33_s23), %s1551_s20 }
   0x7   : > { %p375_p3 = pnand %p1303_p1, %p374_p2  ;;  %p35_p4 = scmp.ge.s32.totalorder %s1832_s23, 2 }
   0x8   : > { %p428_p5 = scmp.lt.s32.totalorder (!%p375_p3), %s1543_s18, 1  ;;  %p430_p6 = scmp.lt.s32.totalorder (!%p375_p3), %s1539_s17, 1  ;;  %vm456_vm0 = vcmask (!%p375_p3), 261120   ;;  %v1491_v7 = vld [vmem:[%s1819_s6] sm:$0xff] (!%p375_p3)   ;;  %v1557_v8 = vmov (!%p375_p3), 0.0   ;;  %v1492_v9 = vld [vmem:[%s1819_s6 + $0x8] sm:$0xff] (!%p375_p3)   ;;  %v683_v55 = vlaneseq (!%p375_p3) }
   0x9   : > { %s1834_s23 = smov (%p35_p4, %s1832_s23), 0  ;;  %378 = sbr.rel (%p375_p3) target bundleno = 1823 (0x71f), region = 64 }
   0xa   : > { %1374 = vmatprep.subr.bf16.mxu1 (!%p375_p3), %v1557_v8  ;;  %1366 = vmatprep.subr.bf16.mxu0 (!%p375_p3), %v1557_v8  ;;  %v1493_v10 = vld [vmem:[%s1817_s4] sm:$0xff] (!%p375_p3)   ;;  %vm1558_vm1 = vmmov (!%p375_p3), 0   ;;  %v1494_v13 = vld [vmem:[%s1817_s4 + $0x8] sm:$0xff] (!%p375_p3)   ;;  %vm634_vm4 = vcmask (!%p375_p3), 64512   ;;  %s1560_s27 = smov (!%p375_p3), 112   ;;  %s1561_s30 = smov (!%p375_p3), 104  }
   0xb   : > { %1375 = vmatpush3.bf16.msra.mxu1 (!%p375_p3), %v1491_v7  ;;  %1378 = vmatprep.mubr.msk.bf16.mxu1 (!%p375_p3), %vm1558_vm1, %v1557_v8  ;;  %v1310_v23 = vld [vmem:[%s1815_s2] ss:$0 sm:$0xff] (!%p375_p3)  ;;  %v684_v57 = vshrl.u32 (!%p375_p3), %v683_v55, 7  ;;  %v1562_v59 = vmov (!%p375_p3), 0   ;;  %vm689_vm7 = vcmask (!%p375_p3), 130048   ;;  %s1565_s16 = smov (!%p375_p3), 72  }
   0xc   : > { %1376 = vmatprep.subr.bf16.mxu1 (!%p375_p3), %v1557_v8  ;;  %1370 = vmatprep.mubr.msk.bf16.mxu0 (!%p375_p3), %vm1558_vm1, %v1557_v8  ;;  %v1311_v26 = vld [vmem:[%s1816_s3] ss:$0 sm:$0xff] (!%p375_p3)  ;;  %vm753_vm8 = vcmask (!%p375_p3), 60416   ;;  %s1569_s13 = smov (!%p375_p3), 24   ;;  %vm876_vm9 = vcmask (!%p375_p3), 126016   ;;  %vm998_vm10 = vcmask (!%p375_p3), 191616  }
   0xd   : > { %1367 = vmatpush3.bf16.msra.mxu0 (!%p375_p3), %v1493_v10  ;;  %v1316_v30 = vld [vmem:[%s1820_s7] ss:$0 sm:$0xff] (!%p375_p3)  ;;  %v685_v58 = vsub.s32 (!%p375_p3), 0, %v684_v57  ;;  %vm1120_vm11 = vcmask (!%p375_p3), 257216  }
   0xe   : > { %1368 = vmatprep.subr.bf16.mxu0 (!%p375_p3), %v1557_v8  ;;  %v1312_v39 = vld [vmem:[%s1818_s5] ss:$0 sm:$0xff] (!%p375_p3) }
   0xf   : > { %1377 = vmatpush3.bf16.msra.mxu1 (!%p375_p3), %v1492_v9 }
  0x10   : > { %s1836_s18 = smov (!%p428_p5, %s1543_s18), 1  ;;  %s1838_s17 = smov (!%p430_p6, %s1539_s17), 1  ;;  %1388 = vmatprep.subr.bf16.mxu1 %v1557_v8 }
  0x11   : > { %s1304_s24 = sshll.u32 %s1836_s18, 1  ;;  %s1337_s15 = sshll.u32 %s1836_s18, 4  ;;  %1369 = vmatpush3.bf16.msra.mxu0 %v1494_v13 }
  0x12   : > { %s1663_s25 = sadd.s32 %s1304_s24, %s1838_s17  ;;  %s440_s28 = scalar_lea.vmem %s1814_s1, %s1337_s15  ;;  %1382 = vmatprep.subr.bf16.mxu0 %v1557_v8 }
  0x13   : > { %s1305_s26 = sshll.u32 %s1663_s25, 3  ;;  %v494_v11 = vld [vmem:[%s440_s28] sm:$0xff]  ;;  %v495_v12 = vld [vmem:[%s440_s28 + $0x8] sm:$0xff]  ;;  %s1559_s24 = smov 120  }
  0x14   : > { %s435_s29 = scalar_lea.vmem %s1813_s0, %s1305_s26  ;;  %v496_v14 = vpack.c.bf16 %v495_v12, %v494_v11  ;;  %s443_s14 = scalar_lea.vmem %s1823_s10, %s1836_s18 }
  0x15   : > { %v1671_v0 = vld [vmem:[%s435_s29] sm:$0xff]  ;;  %s1563_s18 = smov 88   ;;  %s1564_s15 = smov 96  }
  0x16   : > { %v457_v1 = vsel %vm456_vm0, %v1671_v0, 0.0  ;;  %1379 = vmatmul.mubr.msk.bf16.vlgmr.msra.gmra.mrb[0].mxu1 %vm456_vm0, %v496_v14  ;;  %v632_v56 = vld [vmem:[%s443_s14] sm:$0x1]  ;;  %s1566_s17 = smov 80  }
  0x17   : > { %458 = vadd.xlane.f32.xlu0 %v457_v1  ;;  %1390 = vmatprep.mubr.msk.bf16.mxu1 %vm1558_vm1, %v1557_v8  ;;  %vm633_vm5 = vcmp.ne.s32.totalorder %v632_v56, 0 }
  0x18   : > { %v682_v60 = vsel %vm633_vm5, 1, %v1562_v59 }
  0x19   : > { %v686_v61 = vrot.slane %v682_v60, %v685_v58 }
  0x1b   : > { %vm687_vm6 = vcmp.eq.s32.totalorder %v686_v61, 1 }
  0xa4   : > { %v459_v2 = vpop.xlane.xlu0 %458 }
  0xa5   : > { %v461_v3 = vmul.f32 0.03125, %v459_v2 }
  0xa7   : > { %v462_v4 = vsub.f32 %v1671_v0, %v461_v3 }
  0xa9   : > { %v463_v5 = vmul.f32 %v462_v4, %v462_v4  ;;  %v475_v24 = vmul.f32 %v1310_v23, %v462_v4 }
  0xab   : > { %v464_v6 = vsel %vm456_vm0, %v463_v5, 0.0 }
  0xac   : > { %465 = vadd.xlane.f32.xlu0 %v464_v6 }
  0xe9   : > { %v624_v31 = vpop.f32.mrb[0].mxu1 }
  0xea   : > { %v625_v32 = vadd.f32 %v1316_v30, %v624_v31  ;;  %v1380_v33 = vpop.f32.mrb[1].mxu1 }
  0xeb   : > { %v627_v34 = vpop.f32.mrb[2].mxu1 }
  0xec   : > { %v628_v35 = vadd.f32 %v1316_v30, %v627_v34  ;;  %v1381_v36 = vpop.f32.mrb[3].mxu1 }
  0xee   : > { %v1718_v37 = vpack.c.bf16 %v628_v35, %v625_v32 }
  0xf0   : > { %758 = vrot.lane.b32.xlu1 %v1718_v37, %s1559_s24  ;;  %880 = vrot.lane.b32.xlu0 %v1718_v37, %s1560_s27  ;;  %v639_v38 = vsel %vm634_vm4, %v1718_v37, 0 }
 0x139   : > { %v466_v15 = vpop.xlane.xlu0 %465 }
 0x13a   : > { %v468_v16 = vmul.f32 0.032258064, %v466_v15 }
 0x13c   : > { %1497 = vrsqrt.f32 %v468_v16  ;;  %vm478_vm2 = vcmp.eq.f32.partialorder %v468_v16, inf  ;;  %v481_v19 = vand.u32 2147483648, %v468_v16  ;;  %vm480_vm3 = vcmp.eq.f32.partialorder %v468_v16, 0.0 }
 0x146   : > { %v1498_v17 = vpop.eup %1497 }
 0x147   : > { %v477_v18 = vmul.f32 %v1498_v17, %v468_v16 }
 0x149   : > { %v479_v20 = vsel %vm478_vm2, %v468_v16, %v477_v18 }
 0x14a   : > { %v482_v21 = vsel %vm480_vm3, %v481_v19, %v479_v20 }
 0x14b   : > { %v483_v22 = vadd.f32 1e-06, %v482_v21 }
 0x14d   : > { %1499 = vrcp.f32 %v483_v22 }
 0x157   : > { %v1500_v25 = vpop.eup %1499 }
 0x158   : > { %v485_v27 = vmul.f32 %v1500_v25, %v475_v24 }
 0x15a   : > { %v492_v28 = vadd.f32 %v1311_v26, %v485_v27 }
 0x15c   : > { %v493_v29 = vpack.c.bf16 %v492_v28, %v492_v28 }
 0x15e   : > { %1371 = vmatmul.mubr.msk.bf16.vlgmr.msra.gmra.mrb[0].mxu0 %vm456_vm0, %v493_v29 }
 0x15f   : > { %1384 = vmatprep.mubr.msk.bf16.mxu0 %vm1558_vm1, %v1557_v8  ;;  %1383 = vmatpush3.bf16.xpose.msra.mxu0 %v639_v38 }
 0x160   : > { %1394 = vmatprep.subr.bf16.mxu0 %v1557_v8 }
 0x162   : > { %v759_v41 = vpop.permute.xlu1 %758  ;;  %v881_v48 = vpop.permute.xlu0 %880 }
 0x163   : > { %v764_v47 = vsel %vm634_vm4, %v759_v41, 0  ;;  %v886_v50 = vsel %vm634_vm4, %v881_v48, 0 }
 0x231   : > { %v557_v40 = vpop.f32.mrb[0].mxu0 }
 0x232   : > { %v558_v42 = vadd.f32 %v1312_v39, %v557_v40  ;;  %v1372_v43 = vpop.f32.mrb[1].mxu0 }
 0x233   : > { %v560_v44 = vpop.f32.mrb[2].mxu0 }
 0x234   : > { %v563_v45 = vpack.c.bf16 %v558_v42, %v558_v42  ;;  %v1373_v46 = vpop.f32.mrb[3].mxu0 }
 0x236   : > { %756 = vrot.lane.b32.xlu1 %v563_v45, %s1559_s24  ;;  %1385 = vmatmul.mubr.msk.bf16.vlgmr.msra.gmra.mrb[4].mxu0 %vm634_vm4, %v563_v45  ;;  %s1567_s24 = smov 8  }
 0x237   : > { %1395 = vmatpush3.bf16.xpose.msra.mxu0 %v764_v47  ;;  %1396 = vmatprep.mubr.msk.bf16.mxu0 %vm1558_vm1, %v1557_v8 }
 0x238   : > { %1406 = vmatprep.subr.bf16.mxu0 %v1557_v8 }
 0x23a   : > { %878 = vrot.lane.b32.xlu1 %v563_v45, %s1560_s27  ;;  %s1568_s27 = smov 16  }
 0x23e   : > { %1002 = vrot.lane.b32.xlu1 %v1718_v37, %s1561_s30 }
 0x242   : > { %1000 = vrot.lane.b32.xlu1 %v563_v45, %s1561_s30 }
 0x2a8   : > { %v757_v49 = vpop.permute.xlu1 %756 }
 0x2a9   : > { %1397 = vmatmul.mubr.msk.bf16.vlgmr.msra.gmra.mrb[8].mxu0 %vm634_vm4, %v757_v49 }
 0x2aa   : > { %1407 = vmatpush3.bf16.xpose.msra.mxu0 %v886_v50  ;;  %1408 = vmatprep.mubr.msk.bf16.mxu0 %vm1558_vm1, %v1557_v8 }
 0x2ab   : > { %1418 = vmatprep.subr.bf16.mxu0 %v1557_v8 }
 0x2ac   : > { %v879_v51 = vpop.permute.xlu1 %878 }
 0x2b0   : > { %v1003_v52 = vpop.permute.xlu1 %1002 }
 0x2b1   : > { %v1008_v53 = vsel %vm634_vm4, %v1003_v52, 0  ;;  %1409 = vmatmul.mubr.msk.bf16.vlgmr.msra.gmra.mrb[12].mxu0 %vm634_vm4, %v879_v51 }
 0x2b2   : > { %1419 = vmatpush3.bf16.xpose.msra.mxu0 %v1008_v53  ;;  %1420 = vmatprep.mubr.msk.bf16.mxu0 %vm1558_vm1, %v1557_v8 }
 0x2b3   : > { %1430 = vmatprep.subr.bf16.mxu0 %v1557_v8 }
 0x2b4   : > { %v1001_v54 = vpop.permute.xlu1 %1000 }
 0x2b9   : > { %1421 = vmatmul.mubr.msk.bf16.vlgmr.msra.gmra.mrb[16].mxu0 %vm634_vm4, %v1001_v54 }
 0x2ba   : > { %1434 = vmatprep.mubr.msk.bf16.mxu0 %vm1558_vm1, %v1557_v8 }
 0x309   : > { %v675_v62 = vpop.f32.mrb[4].mxu0 }
 0x30a   : > { %v681_v63 = vmul.f32 0.35355338, %v675_v62  ;;  %v1386_v1 = vpop.f32.mrb[5].mxu0 }
 0x30b   : > { %v678_v2 = vpop.f32.mrb[6].mxu0 }
 0x30c   : > { %v1387_v3 = vpop.f32.mrb[7].mxu0  ;;  %v688_v4 = vsel %vm687_vm6, %v681_v63, -1e+09 }
 0x30d   : > { %v690_v5 = vsel %vm689_vm7, %v688_v4, -inf }
 0x30e   : > { %691 = vmax.xlane.f32.xlu1 %v690_v5 }
 0x37c   : > { %v800_v6 = vpop.f32.mrb[8].mxu0 }
 0x37d   : > { %v806_v7 = vmul.f32 0.35355338, %v800_v6  ;;  %v1398_v9 = vpop.f32.mrb[9].mxu0 }
 0x37e   : > { %v803_v10 = vpop.f32.mrb[10].mxu0 }
 0x37f   : > { %v1399_v11 = vpop.f32.mrb[11].mxu0  ;;  %v807_v12 = vsel %vm687_vm6, %v806_v7, -1e+09 }
 0x380   : > { %v808_v13 = vsel %vm689_vm7, %v807_v12, -inf }
 0x381   : > { %809 = vmax.xlane.f32.xlu0 %v808_v13 }
 0x384   : > { %v922_v14 = vpop.f32.mrb[12].mxu0 }
 0x385   : > { %v928_v15 = vmul.f32 0.35355338, %v922_v14  ;;  %v1410_v16 = vpop.f32.mrb[13].mxu0 }
 0x386   : > { %v925_v17 = vpop.f32.mrb[14].mxu0 }
 0x387   : > { %v1411_v18 = vpop.f32.mrb[15].mxu0  ;;  %v929_v19 = vsel %vm687_vm6, %v928_v15, -1e+09 }
 0x388   : > { %v930_v20 = vsel %vm689_vm7, %v929_v19, -inf }
 0x389   : > { %931 = vmax.xlane.f32.xlu1 %v930_v20 }
 0x38c   : > { %v1044_v21 = vpop.f32.mrb[16].mxu0 }
 0x38d   : > { %v1050_v22 = vmul.f32 0.35355338, %v1044_v21  ;;  %v1422_v23 = vpop.f32.mrb[17].mxu0 }
 0x38e   : > { %v1047_v24 = vpop.f32.mrb[18].mxu0 }
 0x38f   : > { %v1423_v25 = vpop.f32.mrb[19].mxu0  ;;  %v1051_v26 = vsel %vm687_vm6, %v1050_v22, -1e+09 }
 0x390   : > { %v1052_v27 = vsel %vm689_vm7, %v1051_v26, -inf }
 0x391   : > { %1053 = vmax.xlane.f32.xlu1 %v1052_v27 }
 0x39b   : > { %v692_v28 = vpop.xlane.xlu1 %691 }
 0x39c   : > { %v693_v29 = vsub.f32 %v688_v4, %v692_v28 }
 0x39e   : > { %v694_v30 = vmul.f32 1.442695, %v693_v29 }
 0x3a0   : > { %1501 = vpow2.f32 %v694_v30 }
 0x3aa   : > { %v1502_v31 = vpop.eup %1501 }
 0x3ab   : > { %v696_v32 = vsel %vm689_vm7, %v1502_v31, 0.0 }
 0x3ac   : > { %697 = vadd.xlane.f32.xlu0 %v696_v32 }
 0x40e   : > { %v810_v33 = vpop.xlane.xlu0 %809 }
 0x40f   : > { %v811_v34 = vsub.f32 %v807_v12, %v810_v33  ;;  %v1495_v33 = vld [vmem:[%s1821_s8] sm:$0xff]  }
 0x410   : > { %1431 = vmatpush3.bf16.msra.mxu0 %v1495_v33 }
 0x411   : > { %v812_v35 = vmul.f32 1.442695, %v811_v34  ;;  %v1496_v34 = vld [vmem:[%s1821_s8 + $0x8] sm:$0xff]   ;;  %1432 = vmatprep.subr.bf16.mxu0 %v1557_v8 }
 0x413   : > { %1503 = vpow2.f32 %v812_v35 }
 0x414   : > { %1433 = vmatpush3.bf16.msra.mxu0 %v1496_v34 }
 0x416   : > { %v932_v36 = vpop.xlane.xlu1 %931 }
 0x417   : > { %v933_v38 = vsub.f32 %v929_v19, %v932_v36 }
 0x419   : > { %v934_v39 = vmul.f32 1.442695, %v933_v38 }
 0x41b   : > { %1505 = vpow2.f32 %v934_v39 }
 0x41d   : > { %v1504_v40 = vpop.eup %1503 }
 0x41e   : > { %v814_v41 = vsel %vm689_vm7, %v1504_v40, 0.0  ;;  %v1054_v44 = vpop.xlane.xlu1 %1053 }
 0x41f   : > { %815 = vadd.xlane.f32.xlu1 %v814_v41  ;;  %v1055_v45 = vsub.f32 %v1051_v26, %v1054_v44 }
 0x421   : > { %v1056_v46 = vmul.f32 1.442695, %v1055_v45 }
 0x423   : > { %1507 = vpow2.f32 %v1056_v46 }
 0x425   : > { %v1506_v42 = vpop.eup %1505 }
 0x426   : > { %v936_v43 = vsel %vm689_vm7, %v1506_v42, 0.0 }
 0x427   : > { %937 = vadd.xlane.f32.xlu0 %v936_v43 }
 0x42d   : > { %v1508_v47 = vpop.eup %1507 }
 0x42e   : > { %v1058_v48 = vsel %vm689_vm7, %v1508_v47, 0.0 }
 0x430   : > { %823 = vrot.lane.b32.xlu1 %v1718_v37, %s1563_s18 }
 0x439   : > { %v698_v49 = vpop.xlane.xlu0 %697 }
 0x43a   : > { %1509 = vrcp.f32 %v698_v49 }
 0x43d   : > { %706 = vrot.lane.b32.xlu0 %v1718_v37, %s1564_s15 }
 0x441   : > { %1067 = vrot.lane.b32.xlu0 %v1718_v37, %s1565_s16 }
 0x444   : > { %v1510_v50 = vpop.eup %1509 }
 0x445   : > { %v700_v51 = vmul.f32 %v1510_v50, %v698_v49 }
 0x447   : > { %v701_v53 = vsub.f32 2.0, %v700_v51 }
 0x449   : > { %v702_v54 = vmul.f32 %v1510_v50, %v701_v53 }
 0x44b   : > { %v703_v56 = vmul.f32 %v1502_v31, %v702_v54 }
 0x44d   : > { %v704_v60 = vpack.c.bf16 %v703_v56, %v703_v56 }
 0x454   : > { %1059 = vadd.xlane.f32.xlu1 %v1058_v48 }
 0x465   : > { %945 = vrot.lane.b32.xlu1 %v1718_v37, %s1566_s17  ;;  %s451_s17 = scalar_lea.vmem %s1824_s11, %s1305_s26 }
 0x4ac   : > { %v816_v52 = vpop.xlane.xlu1 %815 }
 0x4ad   : > { %1511 = vrcp.f32 %v816_v52 }
 0x4b0   : > { %v824_v37 = vpop.permute.xlu1 %823 }
 0x4b4   : > { %v938_v55 = vpop.xlane.xlu0 %937 }
 0x4b5   : > { %1513 = vrcp.f32 %v938_v55 }
 0x4b7   : > { %v1512_v57 = vpop.eup %1511 }
 0x4b8   : > { %v818_v58 = vmul.f32 %v1512_v57, %v816_v52  ;;  %v707_v59 = vpop.permute.xlu0 %706 }
 0x4b9   : > { %1389 = vmatpush3.bf16.msra.mxu1 %v707_v59 }
 0x4ba   : > { %v819_v61 = vsub.f32 2.0, %v818_v58  ;;  %1400 = vmatprep.subr.bf16.mxu1 %v1557_v8 }
 0x4bc   : > { %v820_v62 = vmul.f32 %v1512_v57, %v819_v61  ;;  %1391 = vmatmul.mubr.msk.bf16.vlgmr.msra.gmra.mrb[4].mxu1 %vm689_vm7, %v704_v60  ;;  %v1068_v11 = vpop.permute.xlu0 %1067 }
 0x4bd   : > { %1401 = vmatpush3.bf16.msra.mxu1 %v824_v37  ;;  %1402 = vmatprep.mubr.msk.bf16.mxu1 %vm1558_vm1, %v1557_v8 }
 0x4be   : > { %v821_v63 = vmul.f32 %v1504_v40, %v820_v62  ;;  %1412 = vmatprep.subr.bf16.mxu1 %v1557_v8 }
 0x4bf   : > { %v1514_v2 = vpop.eup %1513 }
 0x4c0   : > { %v822_v1 = vpack.c.bf16 %v821_v63, %v821_v63  ;;  %v940_v3 = vmul.f32 %v1514_v2, %v938_v55 }
 0x4c2   : > { %v941_v4 = vsub.f32 2.0, %v940_v3 }
 0x4c4   : > { %1403 = vmatmul.mubr.msk.bf16.vlgmr.msra.gmra.mrb[8].mxu1 %vm689_vm7, %v822_v1  ;;  %v942_v5 = vmul.f32 %v1514_v2, %v941_v4 }
 0x4c5   : > { %1414 = vmatprep.mubr.msk.bf16.mxu1 %vm1558_vm1, %v1557_v8 }
 0x4c6   : > { %v943_v7 = vmul.f32 %v1506_v42, %v942_v5 }
 0x4c8   : > { %v944_v10 = vpack.c.bf16 %v943_v7, %v943_v7 }
 0x4e1   : > { %v1060_v6 = vpop.xlane.xlu1 %1059 }
 0x4e2   : > { %1515 = vrcp.f32 %v1060_v6 }
 0x4e5   : > { %v946_v9 = vpop.permute.xlu1 %945 }
 0x4e6   : > { %1413 = vmatpush3.bf16.msra.mxu1 %v946_v9 }
 0x4e7   : > { %1424 = vmatprep.subr.bf16.mxu1 %v1557_v8 }
 0x4e9   : > { %1415 = vmatmul.mubr.msk.bf16.vlgmr.msra.gmra.mrb[12].mxu1 %vm689_vm7, %v944_v10 }
 0x4ea   : > { %1425 = vmatpush3.bf16.msra.mxu1 %v1068_v11  ;;  %1426 = vmatprep.mubr.msk.bf16.mxu1 %vm1558_vm1, %v1557_v8  ;;  %v1331_v8 = vld [vmem:[%s1822_s9] ss:$0 sm:$0xff] }
 0x4eb   : > { %v1129_v45 = vadd.f32 %v1331_v8, %v1671_v0 }
 0x4ec   : > { %v1516_v12 = vpop.eup %1515 }
 0x4ed   : > { %v1062_v13 = vmul.f32 %v1516_v12, %v1060_v6 }
 0x4ef   : > { %v1063_v14 = vsub.f32 2.0, %v1062_v13 }
 0x4f1   : > { %v1064_v15 = vmul.f32 %v1516_v12, %v1063_v14 }
 0x4f3   : > { %v1065_v16 = vmul.f32 %v1508_v47, %v1064_v15 }
 0x4f5   : > { %v1066_v17 = vpack.c.bf16 %v1065_v16, %v1065_v16 }
 0x4f7   : > { %1427 = vmatmul.mubr.msk.bf16.vlgmr.msra.gmra.mrb[16].mxu1 %vm689_vm7, %v1066_v17 }
 0x58f   : > { %v746_v18 = vpop.f32.mrb[4].mxu1 }
 0x590   : > { %v752_v19 = vpack.c.bf16 %v746_v18, %v746_v18  ;;  %v1392_v20 = vpop.f32.mrb[5].mxu1 }
 0x591   : > { %v749_v21 = vpop.f32.mrb[6].mxu1 }
 0x592   : > { %754 = vst.msk [vmem:[#allocation2] sm:$0xf] %vm753_vm8, %v752_v19  ;;  %v1393_v22 = vpop.f32.mrb[7].mxu1 }
 0x597   : > { %v863_v23 = vpop.f32.mrb[8].mxu1 }
 0x598   : > { %v1338_v24 = vpack.c.bf16 %v863_v23, %v863_v23  ;;  %v1404_v25 = vpop.f32.mrb[9].mxu1 }
 0x599   : > { %v866_v26 = vpop.f32.mrb[10].mxu1 }
 0x59a   : > { %873 = vrot.lane.b32.xlu1 %v1338_v24, %s1567_s24  ;;  %v1405_v27 = vpop.f32.mrb[11].mxu1 }
 0x5bc   : > { %v985_v28 = vpop.f32.mrb[12].mxu1 }
 0x5bd   : > { %v1339_v29 = vpack.c.bf16 %v985_v28, %v985_v28  ;;  %v1416_v30 = vpop.f32.mrb[13].mxu1 }
 0x5be   : > { %v988_v31 = vpop.f32.mrb[14].mxu1 }
 0x5bf   : > { %995 = vrot.lane.b32.xlu0 %v1339_v29, %s1568_s27  ;;  %v1417_v32 = vpop.f32.mrb[15].mxu1 }
 0x5ca   : > { %v1107_v35 = vpop.f32.mrb[16].mxu1 }
 0x5cb   : > { %v1340_v36 = vpack.c.bf16 %v1107_v35, %v1107_v35  ;;  %v1428_v38 = vpop.f32.mrb[17].mxu1 }
 0x5cc   : > { %v1110_v39 = vpop.f32.mrb[18].mxu1 }
 0x5cd   : > { %1117 = vrot.lane.b32.xlu1 %v1340_v36, %s1569_s13  ;;  %v1429_v40 = vpop.f32.mrb[19].mxu1 }
 0x60c   : > { %v874_v41 = vpop.permute.xlu1 %873 }
 0x60d   : > { %877 = vst.msk [vmem:[#allocation2] sm:$0xf] %vm876_vm9, %v874_v41 }
 0x631   : > { %v996_v42 = vpop.permute.xlu0 %995 }
 0x632   : > { %999 = vst.msk [vmem:[#allocation2] sm:$0xf] %vm998_vm10, %v996_v42 }
 0x63f   : > { %v1118_v43 = vpop.permute.xlu1 %1117 }
 0x640   : > { %1121 = vst.msk [vmem:[#allocation2] sm:$0xf] %vm1120_vm11, %v1118_v43 }
 0x647   : > { %v1130_v44 = vld [vmem:[#allocation2] sm:$0xf] }
 0x648   : > { %1435 = vmatmul.mubr.msk.bf16.vlgmr.msra.gmra.mrb[20].mxu0 %vm456_vm0, %v1130_v44 }
 0x71b   : > { %v1184_v46 = vpop.f32.mrb[20].mxu0 }
 0x71c   : > { %v1190_v47 = vadd.f32 %v1184_v46, %v1129_v45  ;;  %v1436_v48 = vpop.f32.mrb[21].mxu0 }
 0x71d   : > { %v1187_v49 = vpop.f32.mrb[22].mxu0 }
 0x71e   : > { %1191 = vst.msk [vmem:[%s451_s17] sm:$0xff] %vm456_vm0, %v1190_v47  ;;  %v1437_v50 = vpop.f32.mrb[23].mxu0 }
 0x71f PF: > { %s21_s21 = sadd.s32 1, %s1555_s21   ;;  %s1825_s17 = smov %s1547_s19 }
 0x720   : > { %p18_p7 = scmp.ge.s32.totalorder %s21_s21, 6   ;;  %s1826_s18 = smov %s1551_s20 }
 0x721   : > { %s1827_s19 = smov %s1830_s22  ;;  %s1828_s20 = smov %s1834_s23 }
 0x722   :  { %20 = sbr.rel (!%p18_p7) target bundleno = 3 (0x3), region = 100 }

// kernel: decoder_layer.3
= control target key start
LH: loop header
LB: loop body
LE: loop exit
PB: predicated region body
PF: predicated region fallthrough
CT: control target
= control target key end

     0   :  { %s1543_s27 = smov 0   ;;  %s1545_s28 = smov 0   ;;  %s1741_s0 = inlined_call_operand.vmem [shape: f32[2,16,32], index: 0, kind: input, shape index: {}, may-alias: {0,1}]   ;;  %s1742_s1 = inlined_call_operand.vmem [shape: f32[2,16,32], index: 1, kind: input, shape index: {}, may-alias: {0,1}]   ;;  %s1743_s2 = inlined_call_operand.vmem [shape: f32[1,32], index: 2, kind: input, shape index: {}]   ;;  %s1744_s3 = inlined_call_operand.vmem [shape: f32[1,32], index: 3, kind: input, shape index: {}]   ;;  %s1745_s4 = inlined_call_operand.vmem [shape: bf16[32,96], index: 4, kind: input, shape index: {}]   ;;  %s1746_s5 = inlined_call_operand.vmem [shape: f32[1,96], index: 5, kind: input, shape index: {}]   ;;  %s1747_s6 = inlined_call_operand.vmem [shape: bf16[32,32], index: 6, kind: input, shape index: {}]   ;;  %s1748_s7 = inlined_call_operand.vmem [shape: f32[1,32], index: 7, kind: input, shape index: {}]   ;;  %s1749_s8 = inlined_call_operand.vmem [shape: f32[2,16,32], index: 8, kind: output, shape index: {}]  }
   0x1   :  { %s1547_s29 = smov 0   ;;  %s1549_s30 = smov 0  }
   0x2   :  { %s1551_s9 = smov 0  }
   0x3 LB: > { %s27_s10 = sadd.s32 1, %s1476_s29  ;;  %s30_s11 = sadd.s32 1, %s1480_s30  ;;  %s1484_s9 = sphi %s1551_s9, %s18_s9   ;;  %s1480_s30 = sphi %s1549_s30, %s1753_s30   ;;  %s1476_s29 = sphi %s1547_s29, %s1752_s29   ;;  %s1472_s28 = sphi %s1545_s28, %s1751_s28   ;;  %s1468_s27 = sphi %s1543_s27, %s1750_s27  }
   0x4   : > { %p28_p0 = scmp.ge.s32.totalorder %s27_s10, 2  ;;  %p1229_p1 = scmp.ge.s32.totalorder %s1484_s9, 1 }
   0x5   : > { %p291_p2 = scmp.lt.s32.totalorder %s1484_s9, 5 }
   0x6   : > { %s1755_s10 = smov (%p28_p0, %s27_s10), 0  ;;  %s1757_s11 = smov (!%p28_p0, %s30_s11), %s1480_s30 }
   0x7   : > { %p292_p3 = pnand %p1229_p1, %p291_p2  ;;  %p32_p4 = scmp.ge.s32.totalorder %s1757_s11, 2 }
   0x8   : > { %p336_p5 = scmp.lt.s32.totalorder (!%p292_p3), %s1472_s28, 1  ;;  %p338_p6 = scmp.lt.s32.totalorder (!%p292_p3), %s1468_s27, 1  ;;  %vm361_vm0 = vcmask (!%p292_p3), 261120   ;;  %v1415_v21 = vld [vmem:[%s1745_s4 + $0x8] sm:$0xff] (!%p292_p3)   ;;  %v1414_v22 = vld [vmem:[%s1745_s4] sm:$0xff] (!%p292_p3)   ;;  %v1487_v23 = vmov (!%p292_p3), 0.0  }
   0x9   : > { %s1759_s11 = smov (%p32_p4, %s1757_s11), 0  ;;  %295 = sbr.rel (%p292_p3) target bundleno = 1801 (0x709), region = 52 }
   0xa   : > { %s1486_s25 = smov (!%p292_p3), 96   ;;  %1290 = vmatprep.subr.bf16.mxu0 (!%p292_p3), %v1487_v23  ;;  %1298 = vmatprep.subr.bf16.mxu1 (!%p292_p3), %v1487_v23  ;;  %vm1488_vm1 = vmmov (!%p292_p3), 0   ;;  %v1629_v24 = vld [vmem:[%s1746_s5] ss:$0 sm:$0xff] (!%p292_p3)  ;;  %vm575_vm8 = vcmask (!%p292_p3), 64512   ;;  %s1489_s20 = smov (!%p292_p3), 120  }
   0xb   : > { %1291 = vmatpush3.bf16.msra.mxu0 (!%p292_p3), %v1414_v22  ;;  %1294 = vmatprep.mubr.msk.bf16.mxu0 (!%p292_p3), %vm1488_vm1, %v1487_v23  ;;  %v1236_v51 = vld [vmem:[%s1743_s2] ss:$0 sm:$0xff] (!%p292_p3)  ;;  %s1490_s21 = smov (!%p292_p3), 112   ;;  %s1243_s23 = sshll.u32 (!%p292_p3), %s1468_s27, 3  ;;  %vm624_vm10 = vcmask (!%p292_p3), 130048   ;;  %vm688_vm11 = vcmask (!%p292_p3), 60416  }
   0xc   : > { %1292 = vmatprep.subr.bf16.mxu0 (!%p292_p3), %v1487_v23  ;;  %1302 = vmatprep.mubr.msk.bf16.mxu1 (!%p292_p3), %vm1488_vm1, %v1487_v23  ;;  %v1237_v58 = vld [vmem:[%s1744_s3] ss:$0 sm:$0xff] (!%p292_p3)  ;;  %s1493_s24 = smov (!%p292_p3), 72   ;;  %s1495_s26 = smov (!%p292_p3), 8   ;;  %vm811_vm12 = vcmask (!%p292_p3), 126016   ;;  %vm933_vm13 = vcmask (!%p292_p3), 191616  }
   0xd   : > { %s1496_s15 = smov (!%p292_p3), 16   ;;  %s1497_s16 = smov (!%p292_p3), 24   ;;  %vm1055_vm14 = vcmask (!%p292_p3), 257216  }
   0xf   : > { %1293 = vmatpush3.bf16.msra.mxu0 (!%p292_p3), %v1415_v21 }
  0x10   : > { %s1761_s28 = smov (!%p336_p5, %s1472_s28), 1  ;;  %1306 = vmatprep.subr.bf16.mxu0 %v1487_v23 }
  0x11   : > { %s339_s12 = scalar_select %p338_p6, %s1468_s27, 1 }
  0x12   : > { %s1261_s13 = sshll.u32 %s1761_s28, 4  ;;  %s1230_s14 = sshll.u32 %s1761_s28, 1 }
  0x13   : > { %s348_s17 = scalar_lea.vmem %s1742_s1, %s1261_s13  ;;  %s1580_s18 = sadd.s32 %s1230_s14, %s339_s12 }
  0x14   : > { %v399_v0 = vld [vmem:[%s348_s17] sm:$0xff]  ;;  %v400_v1 = vld [vmem:[%s348_s17 + $0x8] sm:$0xff]  ;;  %s1231_s19 = sshll.u32 %s1580_s18, 3  ;;  %s1492_s27 = smov 80  }
  0x15   : > { %v401_v2 = vsel %vm361_vm0, %v399_v0, 0.0  ;;  %s343_s22 = scalar_lea.vmem %s1741_s0, %s1231_s19  ;;  %v404_v4 = vsel %vm361_vm0, %v400_v1, 0.0 }
  0x16   : > { %402 = vadd.xlane.f32.xlu0 %v401_v2  ;;  %v1589_v3 = vld [vmem:[%s343_s22] sm:$0xff]  ;;  %s1491_s22 = smov 104  }
  0x17   : > { %v362_v5 = vsel %vm361_vm0, %v1589_v3, 0.0 }
  0x18   : > { %363 = vadd.xlane.f32.xlu1 %v362_v5 }
  0x1a   : > { %405 = vadd.xlane.f32.xlu0 %v404_v4 }
  0xa3   : > { %v403_v6 = vpop.xlane.xlu0 %402 }
  0xa4   : > { %v407_v7 = vmul.f32 0.03125, %v403_v6 }
  0xa5   : > { %v364_v8 = vpop.xlane.xlu1 %363 }
  0xa6   : > { %v1594_v9 = vsub.f32 %v399_v0, %v407_v7  ;;  %v366_v10 = vmul.f32 0.03125, %v364_v8 }
  0xa7   : > { %v406_v11 = vpop.xlane.xlu0 %405 }
  0xa8   : > { %v408_v12 = vmul.f32 0.03125, %v406_v11  ;;  %v1597_v13 = vsub.f32 %v1589_v3, %v366_v10  ;;  %v411_v14 = vmul.f32 %v1594_v9, %v1594_v9  ;;  %v421_v53 = vmul.f32 %v1236_v51, %v1594_v9 }
  0xaa   : > { %v1601_v15 = vsub.f32 %v400_v1, %v408_v12  ;;  %v413_v16 = vsel %vm361_vm0, %v411_v14, 0.0  ;;  %v368_v17 = vmul.f32 %v1597_v13, %v1597_v13  ;;  %v380_v57 = vmul.f32 %v1236_v51, %v1597_v13 }
  0xab   : > { %414 = vadd.xlane.f32.xlu1 %v413_v16 }
  0xac   : > { %v412_v18 = vmul.f32 %v1601_v15, %v1601_v15  ;;  %v369_v19 = vsel %vm361_vm0, %v368_v17, 0.0  ;;  %v422_v54 = vmul.f32 %v1236_v51, %v1601_v15 }
  0xae   : > { %v416_v20 = vsel %vm361_vm0, %v412_v18, 0.0 }
  0xaf   : > { %417 = vadd.xlane.f32.xlu0 %v416_v20  ;;  %370 = vadd.xlane.f32.xlu1 %v369_v19 }
  0xc0   : > { %515 = vrot.lane.b32.xlu1 %v1415_v21, %s1486_s25 }
  0xc4   : > { %519 = vrot.lane.b32.xlu1 %v1629_v24, %s1486_s25 }
  0xc5   : > { %513 = vrot.lane.b32.xlu0 %v1414_v22, %s1486_s25 }
 0x138   : > { %v415_v25 = vpop.xlane.xlu1 %414 }
 0x139   : > { %v419_v26 = vmul.f32 0.032258064, %v415_v25 }
 0x13b   : > { %1418 = vrsqrt.f32 %v419_v26  ;;  %vm425_vm2 = vcmp.eq.f32.partialorder %v419_v26, inf  ;;  %v428_v35 = vand.u32 2147483648, %v419_v26  ;;  %vm427_vm3 = vcmp.eq.f32.partialorder %v419_v26, 0.0 }
 0x13c   : > { %v418_v27 = vpop.xlane.xlu0 %417  ;;  %v371_v28 = vpop.xlane.xlu1 %370 }
 0x13d   : > { %v420_v29 = vmul.f32 0.032258064, %v418_v27  ;;  %v373_v30 = vmul.f32 0.032258064, %v371_v28 }
 0x13f   : > { %1420 = vrsqrt.f32 %v420_v29  ;;  %vm432_vm4 = vcmp.eq.f32.partialorder %v420_v29, inf  ;;  %vm434_vm5 = vcmp.eq.f32.partialorder %v420_v29, 0.0  ;;  %v435_v42 = vand.u32 2147483648, %v420_v29 }
 0x140   : > { %1422 = vrsqrt.f32 %v373_v30  ;;  %v514_v31 = vpop.permute.xlu0 %513  ;;  %v516_v32 = vpop.permute.xlu1 %515  ;;  %vm383_vm6 = vcmp.eq.f32.partialorder %v373_v30, inf  ;;  %v386_v45 = vand.u32 2147483648, %v373_v30  ;;  %vm385_vm7 = vcmp.eq.f32.partialorder %v373_v30, 0.0 }
 0x141   : > { %1299 = vmatpush3.bf16.msra.mxu1 %v514_v31  ;;  %v570_v31 = vstv %s1243_s23  ;;  %s356_s23 = scalar_lea.vmem %s1749_s8, %s1231_s19 }
 0x142   : > { %1300 = vmatprep.subr.bf16.mxu1 %v1487_v23 }
 0x144   : > { %v520_v5 = vpop.permute.xlu1 %519 }
 0x145   : > { %v1419_v33 = vpop.eup %1418  ;;  %1301 = vmatpush3.bf16.msra.mxu1 %v516_v32 }
 0x146   : > { %v424_v34 = vmul.f32 %v1419_v33, %v419_v26  ;;  %1312 = vmatprep.subr.bf16.mxu1 %v1487_v23 }
 0x148   : > { %v426_v36 = vsel %vm425_vm2, %v419_v26, %v424_v34 }
 0x149   : > { %v1421_v37 = vpop.eup %1420  ;;  %v429_v38 = vsel %vm427_vm3, %v428_v35, %v426_v36 }
 0x14a   : > { %v1423_v39 = vpop.eup %1422  ;;  %v437_v40 = vadd.f32 1e-06, %v429_v38  ;;  %v431_v41 = vmul.f32 %v1421_v37, %v420_v29 }
 0x14b   : > { %v382_v43 = vmul.f32 %v1423_v39, %v373_v30 }
 0x14c   : > { %1424 = vrcp.f32 %v437_v40  ;;  %v433_v44 = vsel %vm432_vm4, %v420_v29, %v431_v41  ;;  %v568_v29 = vlaneseq }
 0x14d   : > { %v436_v46 = vsel %vm434_vm5, %v435_v42, %v433_v44  ;;  %v384_v47 = vsel %vm383_vm6, %v373_v30, %v382_v43 }
 0x14e   : > { %v438_v48 = vadd.f32 1e-06, %v436_v46  ;;  %v387_v49 = vsel %vm385_vm7, %v386_v45, %v384_v47  ;;  %v569_v30 = vshrl.u32 %v568_v29, 7  ;;  %v573_v33 = vand.u32 127, %v568_v29 }
 0x14f   : > { %v388_v50 = vadd.f32 1e-06, %v387_v49 }
 0x150   : > { %1426 = vrcp.f32 %v438_v48  ;;  %v571_v32 = vadd.s32 %v570_v31, %v569_v30 }
 0x151   : > { %1428 = vrcp.f32 %v388_v50 }
 0x152   : > { %vm574_vm9 = vcmp.le.s32.totalorder %v573_v33, %v571_v32 }
 0x156   : > { %v1425_v52 = vpop.eup %1424 }
 0x157   : > { %v440_v55 = vmul.f32 %v1425_v52, %v421_v53 }
 0x159   : > { %v443_v62 = vadd.f32 %v1237_v58, %v440_v55 }
 0x15a   : > { %v1427_v56 = vpop.eup %1426 }
 0x15b   : > { %v1429_v59 = vpop.eup %1428  ;;  %v442_v60 = vmul.f32 %v1427_v56, %v422_v54 }
 0x15c   : > { %v390_v61 = vmul.f32 %v1429_v59, %v380_v57 }
 0x15d   : > { %v444_v63 = vadd.f32 %v1237_v58, %v442_v60 }
 0x15e   : > { %v397_v0 = vadd.f32 %v1237_v58, %v390_v61 }
 0x15f   : > { %v445_v1 = vpack.c.bf16 %v444_v63, %v443_v62 }
 0x160   : > { %v398_v2 = vpack.c.bf16 %v397_v0, %v397_v0 }
 0x161   : > { %1303 = vmatmul.mubr.msk.bf16.vlgmr.msra.gmra.mrb[0].mxu1 %vm361_vm0, %v445_v1 }
 0x162   : > { %1295 = vmatmul.mubr.msk.bf16.vlgmr.msra.gmra.mrb[0].mxu0 %vm361_vm0, %v398_v2  ;;  %1314 = vmatprep.mubr.msk.bf16.mxu1 %vm1488_vm1, %v1487_v23 }
 0x163   : > { %1308 = vmatprep.mubr.msk.bf16.mxu0 %vm1488_vm1, %v1487_v23 }
 0x234   : > { %v559_v4 = vpop.f32.mrb[0].mxu1 }
 0x235   : > { %v506_v6 = vpop.f32.mrb[0].mxu0  ;;  %v1304_v7 = vpop.f32.mrb[1].mxu1  ;;  %v560_v11 = vadd.f32 %v559_v4, %v520_v5 }
 0x236   : > { %v507_v8 = vadd.f32 %v1629_v24, %v506_v6  ;;  %v1296_v9 = vpop.f32.mrb[1].mxu0  ;;  %v562_v10 = vpop.f32.mrb[2].mxu1 }
 0x237   : > { %v509_v12 = vpop.f32.mrb[2].mxu0  ;;  %v563_v13 = vadd.f32 %v562_v10, %v520_v5  ;;  %v1305_v14 = vpop.f32.mrb[3].mxu1 }
 0x238   : > { %v512_v15 = vpack.c.bf16 %v507_v8, %v507_v8  ;;  %v1297_v16 = vpop.f32.mrb[3].mxu0 }
 0x239   : > { %v1651_v17 = vpack.c.bf16 %v563_v13, %v560_v11 }
 0x23a   : > { %691 = vrot.lane.b32.xlu0 %v512_v15, %s1489_s20 }
 0x23b   : > { %693 = vrot.lane.b32.xlu1 %v1651_v17, %s1489_s20  ;;  %v580_v18 = vsel %vm575_vm8, %v1651_v17, 0 }
 0x23c   : > { %1307 = vmatpush3.bf16.xpose.msra.mxu0 %v580_v18 }
 0x23d   : > { %1318 = vmatprep.subr.bf16.mxu0 %v1487_v23 }
 0x23e   : > { %813 = vrot.lane.b32.xlu0 %v512_v15, %s1490_s21 }
 0x23f   : > { %815 = vrot.lane.b32.xlu1 %v1651_v17, %s1490_s21 }
 0x242   : > { %935 = vrot.lane.b32.xlu0 %v512_v15, %s1491_s22 }
 0x243   : > { %937 = vrot.lane.b32.xlu1 %v1651_v17, %s1491_s22  ;;  %1309 = vmatmul.mubr.msk.bf16.vlgmr.msra.gmra.mrb[4].mxu0 %vm575_vm8, %v512_v15 }
 0x244   : > { %1320 = vmatprep.mubr.msk.bf16.mxu0 %vm1488_vm1, %v1487_v23 }
 0x2ac   : > { %v692_v22 = vpop.permute.xlu0 %691 }
 0x2ad   : > { %v694_v19 = vpop.permute.xlu1 %693 }
 0x2ae   : > { %v699_v20 = vsel %vm575_vm8, %v694_v19, 0 }
 0x2af   : > { %1319 = vmatpush3.bf16.xpose.msra.mxu0 %v699_v20 }
 0x2b0   : > { %1330 = vmatprep.subr.bf16.mxu0 %v1487_v23  ;;  %v814_v26 = vpop.permute.xlu0 %813 }
 0x2b1   : > { %v816_v21 = vpop.permute.xlu1 %815 }
 0x2b2   : > { %v821_v24 = vsel %vm575_vm8, %v816_v21, 0 }
 0x2b4   : > { %v936_v28 = vpop.permute.xlu0 %935 }
 0x2b5   : > { %v938_v25 = vpop.permute.xlu1 %937 }
 0x2b6   : > { %1321 = vmatmul.mubr.msk.bf16.vlgmr.msra.gmra.mrb[8].mxu0 %vm575_vm8, %v692_v22  ;;  %v943_v27 = vsel %vm575_vm8, %v938_v25, 0 }
 0x2b7   : > { %1331 = vmatpush3.bf16.xpose.msra.mxu0 %v821_v24  ;;  %1332 = vmatprep.mubr.msk.bf16.mxu0 %vm1488_vm1, %v1487_v23 }
 0x2b8   : > { %1342 = vmatprep.subr.bf16.mxu0 %v1487_v23 }
 0x2be   : > { %1333 = vmatmul.mubr.msk.bf16.vlgmr.msra.gmra.mrb[12].mxu0 %vm575_vm8, %v814_v26 }
 0x2bf   : > { %1343 = vmatpush3.bf16.xpose.msra.mxu0 %v943_v27  ;;  %1344 = vmatprep.mubr.msk.bf16.mxu0 %vm1488_vm1, %v1487_v23 }
 0x2c0   : > { %1354 = vmatprep.subr.bf16.mxu0 %v1487_v23 }
 0x2c6   : > { %1345 = vmatmul.mubr.msk.bf16.vlgmr.msra.gmra.mrb[16].mxu0 %vm575_vm8, %v936_v28 }
 0x2c7   : > { %1358 = vmatprep.mubr.msk.bf16.mxu0 %vm1488_vm1, %v1487_v23 }
 0x316   : > { %v616_v34 = vpop.f32.mrb[4].mxu0 }
 0x317   : > { %v622_v35 = vmul.f32 0.35355338, %v616_v34  ;;  %v1310_v36 = vpop.f32.mrb[5].mxu0 }
 0x318   : > { %v619_v37 = vpop.f32.mrb[6].mxu0 }
 0x319   : > { %v1311_v38 = vpop.f32.mrb[7].mxu0  ;;  %v623_v39 = vsel %vm574_vm9, %v622_v35, -1e+09 }
 0x31a   : > { %v625_v40 = vsel %vm624_vm10, %v623_v39, -inf }
 0x31b   : > { %626 = vmax.xlane.f32.xlu1 %v625_v40 }
 0x389   : > { %v735_v41 = vpop.f32.mrb[8].mxu0 }
 0x38a   : > { %v741_v42 = vmul.f32 0.35355338, %v735_v41  ;;  %v1322_v43 = vpop.f32.mrb[9].mxu0 }
 0x38b   : > { %v738_v44 = vpop.f32.mrb[10].mxu0 }
 0x38c   : > { %v1323_v45 = vpop.f32.mrb[11].mxu0  ;;  %v742_v46 = vsel %vm574_vm9, %v741_v42, -1e+09 }
 0x38d   : > { %v743_v47 = vsel %vm624_vm10, %v742_v46, -inf }
 0x38e   : > { %744 = vmax.xlane.f32.xlu0 %v743_v47 }
 0x391   : > { %v857_v48 = vpop.f32.mrb[12].mxu0 }
 0x392   : > { %v863_v49 = vmul.f32 0.35355338, %v857_v48  ;;  %v1334_v50 = vpop.f32.mrb[13].mxu0 }
 0x393   : > { %v860_v51 = vpop.f32.mrb[14].mxu0 }
 0x394   : > { %v1335_v52 = vpop.f32.mrb[15].mxu0  ;;  %v864_v53 = vsel %vm574_vm9, %v863_v49, -1e+09 }
 0x395   : > { %v865_v54 = vsel %vm624_vm10, %v864_v53, -inf }
 0x396   : > { %866 = vmax.xlane.f32.xlu0 %v865_v54 }
 0x399   : > { %v979_v55 = vpop.f32.mrb[16].mxu0 }
 0x39a   : > { %v985_v56 = vmul.f32 0.35355338, %v979_v55  ;;  %v1346_v57 = vpop.f32.mrb[17].mxu0 }
 0x39b   : > { %v982_v58 = vpop.f32.mrb[18].mxu0 }
 0x39c   : > { %v1347_v59 = vpop.f32.mrb[19].mxu0  ;;  %v986_v60 = vsel %vm574_vm9, %v985_v56, -1e+09 }
 0x39d   : > { %v987_v61 = vsel %vm624_vm10, %v986_v60, -inf }
 0x39e   : > { %988 = vmax.xlane.f32.xlu0 %v987_v61 }
 0x3a8   : > { %v627_v62 = vpop.xlane.xlu1 %626 }
 0x3a9   : > { %v628_v63 = vsub.f32 %v623_v39, %v627_v62  ;;  %v1416_v62 = vld [vmem:[%s1747_s6] sm:$0xff]  }
 0x3aa   : > { %1355 = vmatpush3.bf16.msra.mxu0 %v1416_v62 }
 0x3ab   : > { %v629_v0 = vmul.f32 1.442695, %v628_v63  ;;  %1356 = vmatprep.subr.bf16.mxu0 %v1487_v23 }
 0x3ad   : > { %1430 = vpow2.f32 %v629_v0  ;;  %v1417_v0 = vld [vmem:[%s1747_s6 + $0x8] sm:$0xff]  }
 0x3ae   : > { %1357 = vmatpush3.bf16.msra.mxu0 %v1417_v0 }
 0x3b7   : > { %v1431_v1 = vpop.eup %1430 }
 0x3b8   : > { %v631_v2 = vsel %vm624_vm10, %v1431_v1, 0.0 }
 0x3b9   : > { %632 = vadd.xlane.f32.xlu1 %v631_v2 }
 0x3ca   : > { %641 = vrot.lane.b32.xlu1 %v1651_v17, %s1486_s25  ;;  %s1494_s25 = smov 88  }
 0x41b   : > { %v745_v4 = vpop.xlane.xlu0 %744 }
 0x41c   : > { %v746_v5 = vsub.f32 %v742_v46, %v745_v4 }
 0x41e   : > { %v747_v6 = vmul.f32 1.442695, %v746_v5 }
 0x420   : > { %1432 = vpow2.f32 %v747_v6 }
 0x423   : > { %v867_v7 = vpop.xlane.xlu0 %866 }
 0x424   : > { %v868_v8 = vsub.f32 %v864_v53, %v867_v7 }
 0x426   : > { %v869_v9 = vmul.f32 1.442695, %v868_v8 }
 0x428   : > { %1434 = vpow2.f32 %v869_v9 }
 0x42a   : > { %v1433_v10 = vpop.eup %1432 }
 0x42b   : > { %v989_v11 = vpop.xlane.xlu0 %988  ;;  %v749_v12 = vsel %vm624_vm10, %v1433_v10, 0.0 }
 0x42c   : > { %v990_v13 = vsub.f32 %v986_v60, %v989_v11  ;;  %750 = vadd.xlane.f32.xlu0 %v749_v12 }
 0x42e   : > { %v991_v14 = vmul.f32 1.442695, %v990_v13 }
 0x430   : > { %1436 = vpow2.f32 %v991_v14  ;;  %v1255_v14 = vld [vmem:[%s1748_s7] ss:$0 sm:$0xff] }
 0x432   : > { %v1435_v15 = vpop.eup %1434 }
 0x433   : > { %v871_v16 = vsel %vm624_vm10, %v1435_v15, 0.0 }
 0x434   : > { %872 = vadd.xlane.f32.xlu1 %v871_v16 }
 0x43a   : > { %v1437_v18 = vpop.eup %1436 }
 0x43b   : > { %v993_v19 = vsel %vm624_vm10, %v1437_v18, 0.0 }
 0x43c   : > { %994 = vadd.xlane.f32.xlu0 %v993_v19 }
 0x445   : > { %880 = vrot.lane.b32.xlu1 %v1651_v17, %s1492_s27 }
 0x446   : > { %v633_v20 = vpop.xlane.xlu1 %632 }
 0x447   : > { %1438 = vrcp.f32 %v633_v20 }
 0x449   : > { %1002 = vrot.lane.b32.xlu1 %v1651_v17, %s1493_s24 }
 0x44a   : > { %v642_v21 = vpop.permute.xlu1 %641 }
 0x44b   : > { %1313 = vmatpush3.bf16.msra.mxu1 %v642_v21 }
 0x44c   : > { %1324 = vmatprep.subr.bf16.mxu1 %v1487_v23 }
 0x451   : > { %v1439_v22 = vpop.eup %1438 }
 0x452   : > { %v635_v24 = vmul.f32 %v1439_v22, %v633_v20  ;;  %758 = vrot.lane.b32.xlu0 %v1651_v17, %s1494_s25 }
 0x454   : > { %v636_v25 = vsub.f32 2.0, %v635_v24 }
 0x456   : > { %v637_v26 = vmul.f32 %v1439_v22, %v636_v25 }
 0x458   : > { %v638_v27 = vmul.f32 %v1431_v1, %v637_v26 }
 0x45a   : > { %v639_v28 = vpack.c.bf16 %v638_v27, %v638_v27 }
 0x45c   : > { %1315 = vmatmul.mubr.msk.bf16.vlgmr.msra.gmra.mrb[4].mxu1 %vm624_vm10, %v639_v28 }
 0x45d   : > { %1326 = vmatprep.mubr.msk.bf16.mxu1 %vm1488_vm1, %v1487_v23 }
 0x4b9   : > { %v751_v29 = vpop.xlane.xlu0 %750 }
 0x4ba   : > { %1440 = vrcp.f32 %v751_v29 }
 0x4c1   : > { %v873_v30 = vpop.xlane.xlu1 %872 }
 0x4c2   : > { %1442 = vrcp.f32 %v873_v30 }
 0x4c4   : > { %v1441_v31 = vpop.eup %1440 }
 0x4c5   : > { %v753_v32 = vmul.f32 %v1441_v31, %v751_v29  ;;  %v881_v42 = vpop.permute.xlu1 %880 }
 0x4c7   : > { %v754_v33 = vsub.f32 2.0, %v753_v32 }
 0x4c9   : > { %v755_v34 = vmul.f32 %v1441_v31, %v754_v33  ;;  %v995_v35 = vpop.xlane.xlu0 %994  ;;  %v1003_v48 = vpop.permute.xlu1 %1002 }
 0x4ca   : > { %1444 = vrcp.f32 %v995_v35 }
 0x4cb   : > { %v756_v17 = vmul.f32 %v1433_v10, %v755_v34 }
 0x4cc   : > { %v1443_v36 = vpop.eup %1442 }
 0x4cd   : > { %v875_v37 = vmul.f32 %v1443_v36, %v873_v30  ;;  %v759_v38 = vpop.permute.xlu0 %758  ;;  %v757_v39 = vpack.c.bf16 %v756_v17, %v756_v17 }
 0x4ce   : > { %1325 = vmatpush3.bf16.msra.mxu1 %v759_v38 }
 0x4cf   : > { %v876_v40 = vsub.f32 2.0, %v875_v37  ;;  %1336 = vmatprep.subr.bf16.mxu1 %v1487_v23 }
 0x4d1   : > { %v877_v41 = vmul.f32 %v1443_v36, %v876_v40  ;;  %1327 = vmatmul.mubr.msk.bf16.vlgmr.msra.gmra.mrb[8].mxu1 %vm624_vm10, %v757_v39 }
 0x4d2   : > { %1337 = vmatpush3.bf16.msra.mxu1 %v881_v42  ;;  %1338 = vmatprep.mubr.msk.bf16.mxu1 %vm1488_vm1, %v1487_v23 }
 0x4d3   : > { %v878_v43 = vmul.f32 %v1435_v15, %v877_v41  ;;  %1348 = vmatprep.subr.bf16.mxu1 %v1487_v23  ;;  %v1064_v15 = vadd.f32 %v1255_v14, %v1589_v3 }
 0x4d4   : > { %v1445_v44 = vpop.eup %1444 }
 0x4d5   : > { %v997_v45 = vmul.f32 %v1445_v44, %v995_v35  ;;  %v879_v46 = vpack.c.bf16 %v878_v43, %v878_v43 }
 0x4d7   : > { %v998_v47 = vsub.f32 2.0, %v997_v45 }
 0x4d9   : > { %v999_v49 = vmul.f32 %v1445_v44, %v998_v47  ;;  %1339 = vmatmul.mubr.msk.bf16.vlgmr.msra.gmra.mrb[12].mxu1 %vm624_vm10, %v879_v46 }
 0x4da   : > { %1349 = vmatpush3.bf16.msra.mxu1 %v1003_v48  ;;  %1350 = vmatprep.mubr.msk.bf16.mxu1 %vm1488_vm1, %v1487_v23 }
 0x4db   : > { %v1000_v50 = vmul.f32 %v1437_v18, %v999_v49 }
 0x4dd   : > { %v1001_v51 = vpack.c.bf16 %v1000_v50, %v1000_v50 }
 0x4e1   : > { %1351 = vmatmul.mubr.msk.bf16.vlgmr.msra.gmra.mrb[16].mxu1 %vm624_vm10, %v1001_v51 }
 0x52f   : > { %v681_v52 = vpop.f32.mrb[4].mxu1 }
 0x530   : > { %v687_v53 = vpack.c.bf16 %v681_v52, %v681_v52  ;;  %v1316_v54 = vpop.f32.mrb[5].mxu1 }
 0x531   : > { %v684_v55 = vpop.f32.mrb[6].mxu1 }
 0x532   : > { %689 = vst.msk [vmem:[#allocation2] sm:$0xf] %vm688_vm11, %v687_v53  ;;  %v1317_v56 = vpop.f32.mrb[7].mxu1 }
 0x5a4   : > { %v798_v57 = vpop.f32.mrb[8].mxu1 }
 0x5a5   : > { %v1262_v58 = vpack.c.bf16 %v798_v57, %v798_v57  ;;  %v1328_v59 = vpop.f32.mrb[9].mxu1 }
 0x5a6   : > { %v801_v60 = vpop.f32.mrb[10].mxu1 }
 0x5a7   : > { %808 = vrot.lane.b32.xlu1 %v1262_v58, %s1495_s26  ;;  %v1329_v61 = vpop.f32.mrb[11].mxu1 }
 0x5ac   : > { %v920_v63 = vpop.f32.mrb[12].mxu1 }
 0x5ad   : > { %v1263_v1 = vpack.c.bf16 %v920_v63, %v920_v63  ;;  %v1340_v2 = vpop.f32.mrb[13].mxu1 }
 0x5ae   : > { %v923_v4 = vpop.f32.mrb[14].mxu1 }
 0x5af   : > { %930 = vrot.lane.b32.xlu0 %v1263_v1, %s1496_s15  ;;  %v1341_v5 = vpop.f32.mrb[15].mxu1 }
 0x5b4   : > { %v1042_v6 = vpop.f32.mrb[16].mxu1 }
 0x5b5   : > { %v1264_v7 = vpack.c.bf16 %v1042_v6, %v1042_v6  ;;  %v1352_v8 = vpop.f32.mrb[17].mxu1 }
 0x5b6   : > { %v1045_v9 = vpop.f32.mrb[18].mxu1 }
 0x5b7   : > { %1052 = vrot.lane.b32.xlu1 %v1264_v7, %s1497_s16  ;;  %v1353_v10 = vpop.f32.mrb[19].mxu1 }
 0x619   : > { %v809_v11 = vpop.permute.xlu1 %808 }
 0x61a   : > { %812 = vst.msk [vmem:[#allocation2] sm:$0xf] %vm811_vm12, %v809_v11 }
 0x621   : > { %v931_v12 = vpop.permute.xlu0 %930 }
 0x622   : > { %934 = vst.msk [vmem:[#allocation2] sm:$0xf] %vm933_vm13, %v931_v12 }
 0x629   : > { %v1053_v23 = vpop.permute.xlu1 %1052 }
 0x62a   : > { %1056 = vst.msk [vmem:[#allocation2] sm:$0xf] %vm1055_vm14, %v1053_v23 }
 0x631   : > { %v1065_v13 = vld [vmem:[#allocation2] sm:$0xf] }
 0x632   : > { %1359 = vmatmul.mubr.msk.bf16.vlgmr.msra.gmra.mrb[20].mxu0 %vm361_vm0, %v1065_v13 }
 0x705   : > { %v1119_v16 = vpop.f32.mrb[20].mxu0 }
 0x706   : > { %v1125_v18 = vadd.f32 %v1119_v16, %v1064_v15  ;;  %v1360_v19 = vpop.f32.mrb[21].mxu0 }
 0x707   : > { %v1122_v20 = vpop.f32.mrb[22].mxu0 }
 0x708   : > { %1126 = vst.msk [vmem:[%s356_s23] sm:$0xff] %vm361_vm0, %v1125_v18  ;;  %v1361_v21 = vpop.f32.mrb[23].mxu0 }
 0x709 PF: > { %s18_s9 = sadd.s32 1, %s1484_s9   ;;  %s1750_s27 = smov %s1476_s29 }
 0x70a   : > { %p15_p7 = scmp.ge.s32.totalorder %s18_s9, 6   ;;  %s1751_s28 = smov %s1480_s30 }
 0x70b   : > { %s1752_s29 = smov %s1755_s10  ;;  %s1753_s30 = smov %s1759_s11 }
 0x70c   :  { %17 = sbr.rel (!%p15_p7) target bundleno = 3 (0x3), region = 85 }

</bundles_post_ra>
